<compile_context>
chip_gen: v6e
topology: v6e:2x2x1
jax: 0.10.0
libtpu: 0.0.40
codegen_flags: <defaults>
</compile_context>

<pallas_src>
import math
import functools

import jax
import jax.numpy as jnp
from jax import lax
from jax.experimental import pallas as pl
from jax.experimental.pallas import tpu as pltpu


# ---------------------------------------------------------------------------
# Recurrent core kernel (sequential over time, T_blk timesteps per grid step)
# ---------------------------------------------------------------------------
def _rnn_core_kernel(num_layers, t_blk, *refs):
    # ref layout:
    #   [x0, h0, whh0, bhh0,
    #    (w_fused_l, b_fused_l) for l in 1..L-1,
    #    hseq_out, hfinal_out]
    x0_ref = refs[0]            # (t_blk, B, H): precomputed emb@Wxh0 + bxh0
    h0_ref = refs[1]            # (L, B, H)
    whh0_ref = refs[2]          # (H, H)
    bhh0_ref = refs[3]          # (1, H)
    idx = 4
    fused_refs = []
    for _ in range(num_layers - 1):
        fused_refs.append((refs[idx], refs[idx + 1]))
        idx += 2
    hseq_ref = refs[idx]        # (t_blk, B, H) per-step top-layer hidden
    hfinal_ref = refs[idx + 1]  # (L, B, H) VMEM-resident carry across grid

    g = pl.program_id(0)

    @pl.when(g == 0)
    def _():
        hfinal_ref[...] = h0_ref[...]

    # Hoist loop-invariant weight loads out of the time loop.
    whh0 = whh0_ref[...]
    bhh0 = bhh0_ref[...]
    w_fused = [w[...] for (w, _) in fused_refs]
    b_fused = [b[...] for (_, b) in fused_refs]

    hidden0 = tuple(hfinal_ref[l] for l in range(num_layers))

    def step(t, hidden):
        # Layer 0: the x-projection (incl. bxh0) was hoisted to the glue.
        out = jnp.tanh(
            x0_ref[t]
            + jnp.dot(hidden[0], whh0, preferred_element_type=jnp.float32)
            + bhh0)
        new_hidden = [out]
        # Layers 1..L-1: fused [h_prev, out] @ [Whh; Wxh] + (bhh + bxh)
        for l in range(1, num_layers):
            cat = jnp.concatenate([hidden[l], out], axis=-1)   # (B, 2H)
            out = jnp.tanh(
                jnp.dot(cat, w_fused[l - 1],
                        preferred_element_type=jnp.float32)
                + b_fused[l - 1])
            new_hidden.append(out)
        hseq_ref[t] = out
        return tuple(new_hidden)

    hidden = lax.fori_loop(0, t_blk, step, hidden0, unroll=True)

    for l in range(num_layers):
        hfinal_ref[l] = hidden[l]


# ---------------------------------------------------------------------------
# Hoisted output projection kernel (fully parallel grid, full-MXU M = S*B)
# ---------------------------------------------------------------------------
def _proj_kernel(h_ref, w_ref, b_ref, o_ref):
    o_ref[...] = (jnp.dot(h_ref[...], w_ref[...],
                          preferred_element_type=jnp.float32)
                  + b_ref[...])


def _output_projection_pallas(h_rows, wout, bout):
    rows, hidden = h_rows.shape
    vocab = wout.shape[1]
    tm = 128 if rows % 128 == 0 else rows
    tn = 128 if vocab % 128 == 0 else vocab
    grid = (rows // tm, vocab // tn)
    cost = pl.CostEstimate(
        flops=2 * rows * hidden * vocab,
        transcendentals=0,
        bytes_accessed=4 * (rows * hidden + hidden * vocab
                            + vocab + rows * vocab),
    )
    return pl.pallas_call(
        _proj_kernel,
        out_shape=jax.ShapeDtypeStruct((rows, vocab), jnp.float32),
        grid_spec=pltpu.PrefetchScalarGridSpec(
            num_scalar_prefetch=0,
            grid=grid,
            in_specs=[
                pl.BlockSpec((tm, hidden), lambda i, j: (i, 0)),
                pl.BlockSpec((hidden, tn), lambda i, j: (0, j)),
                pl.BlockSpec((1, tn), lambda i, j: (0, j)),
            ],
            out_specs=pl.BlockSpec((tm, tn), lambda i, j: (i, j)),
        ),
        compiler_params=pltpu.CompilerParams(
            dimension_semantics=("parallel", "parallel")),
        cost_estimate=cost,
    )(h_rows, wout, bout)


def _pick_time_block(seq_len, max_block=16):
    if seq_len <= max_block:
        return seq_len
    for cand in range(max_block, 0, -1):
        if seq_len % cand == 0:
            return cand
    return 1


# ---------------------------------------------------------------------------
# Forward wrapper
# ---------------------------------------------------------------------------
def rnn_forward_pallas(tokens, h0, params, *, emb_size, hidden_size,
                       vocab_size, num_layers):
    """Pallas implementation of RNN.forward (eval-mode dropout = identity)."""
    seq_len, batch = tokens.shape

    # XLA glue: embedding gather + scale; hoisted layer-0 input projection
    # over all timesteps at once (no recurrence involved).
    embedded = (params["emb_table"][tokens]
                * math.sqrt(emb_size)).astype(jnp.float32)       # (S, B, E)
    whh0, bhh0, wxh0, bxh0 = params["layers"][0]
    x0 = jnp.dot(embedded.reshape(seq_len * batch, emb_size), wxh0,
                 preferred_element_type=jnp.float32) + bxh0
    x0 = x0.reshape(seq_len, batch, hidden_size)                 # (S, B, H)

    # Fuse per-layer (l >= 1) weights: [Whh; Wxh] (2H, H) and bhh + bxh.
    fused = []
    for l in range(1, num_layers):
        whh, bhh, wxh, bxh = params["layers"][l]
        fused.append((jnp.concatenate([whh, wxh], axis=0), bhh + bxh))

    t_blk = _pick_time_block(seq_len)
    grid = (seq_len // t_blk,)

    args = [x0, h0.astype(jnp.float32), whh0, bhh0]
    in_specs = [
        pl.BlockSpec((t_blk, batch, hidden_size), lambda g: (g, 0, 0)),
        pl.BlockSpec((num_layers, batch, hidden_size), lambda g: (0, 0, 0)),
        pl.BlockSpec((hidden_size, hidden_size), lambda g: (0, 0)),
        pl.BlockSpec((1, hidden_size), lambda g: (0, 0)),
    ]
    for w, b in fused:
        args += [w, b]
        in_specs += [
            pl.BlockSpec((2 * hidden_size, hidden_size), lambda g: (0, 0)),
            pl.BlockSpec((1, hidden_size), lambda g: (0, 0)),
        ]

    out_shape = (
        jax.ShapeDtypeStruct((seq_len, batch, hidden_size), jnp.float32),
        jax.ShapeDtypeStruct((num_layers, batch, hidden_size), jnp.float32),
    )
    out_specs = (
        pl.BlockSpec((t_blk, batch, hidden_size), lambda g: (g, 0, 0)),
        pl.BlockSpec((num_layers, batch, hidden_size), lambda g: (0, 0, 0)),
    )

    flops = (2 * seq_len * batch * hidden_size * hidden_size
             * (1 + 2 * (num_layers - 1)))
    bytes_accessed = 4 * (
        2 * seq_len * batch * hidden_size              # x0 in + hseq out
        + 2 * num_layers * batch * hidden_size         # h0 in + h_final out
        + hidden_size * hidden_size                    # Whh0
        + (num_layers - 1) * 2 * hidden_size * hidden_size  # fused weights
        + num_layers * hidden_size)                    # biases
    cost = pl.CostEstimate(
        flops=flops,
        transcendentals=seq_len * batch * hidden_size * num_layers,
        bytes_accessed=bytes_accessed)

    kernel = functools.partial(_rnn_core_kernel, num_layers, t_blk)
    h_seq, h_final = pl.pallas_call(
        kernel,
        out_shape=out_shape,
        grid_spec=pltpu.PrefetchScalarGridSpec(
            num_scalar_prefetch=0,
            grid=grid,
            in_specs=in_specs,
            out_specs=out_specs,
        ),
        compiler_params=pltpu.CompilerParams(
            dimension_semantics=("arbitrary",)),
        cost_estimate=cost,
    )(*args)

    # Hoisted output projection: one (S*B, H) @ (H, V) matmul on a parallel grid.
    logits = _output_projection_pallas(
        h_seq.reshape(seq_len * batch, hidden_size),
        params["wout"], params["bout"])
    logits = logits.reshape(seq_len, batch, vocab_size)
    return logits, h_final


# ---------------------------------------------------------------------------
# Pure-JAX reference (matches the PyTorch forward; dropout = identity)
# ---------------------------------------------------------------------------
def rnn_forward_ref(tokens, h0, params, *, emb_size):
    seq_len, batch = tokens.shape
    num_layers = h0.shape[0]
    hidden = [h0[l] for l in range(num_layers)]
    logits_steps = []
    for t in range(seq_len):
        out = params["emb_table"][tokens[t]] * math.sqrt(emb_size)
        new_hidden = []
        for l in range(num_layers):
            whh, bhh, wxh, bxh = params["layers"][l]
            h_lin = hidden[l] @ whh + bhh
            out = jnp.tanh(out @ wxh + bxh + h_lin)
            new_hidden.append(out)
        hidden = new_hidden
        logits_steps.append(out @ params["wout"] + params["bout"])
    logits = jnp.stack(logits_steps, axis=0)
    h_final = jnp.stack(hidden, axis=0)
    return logits, h_final


def init_params(key, *, emb_size, hidden_size, vocab_size, num_layers):
    """Deterministic synthetic parameter init (shapes match the PyTorch module,
    weights stored transposed: (in_features, out_features))."""
    keys = jax.random.split(key, 3 + 4 * num_layers)
    ki = iter(keys)
    params = {}
    # WordEmbedding.lut.weight ~ U(-0.1, 0.1)
    params["emb_table"] = jax.random.uniform(
        next(ki), (vocab_size, emb_size), jnp.float32, -0.1, 0.1)
    layers = []
    input_size = emb_size
    for _ in range(num_layers):
        whh = jax.random.uniform(next(ki), (hidden_size, hidden_size),
                                 jnp.float32, -0.1, 0.1)
        bhh = jax.random.uniform(next(ki), (1, hidden_size),
                                 jnp.float32, -0.1, 0.1)
        wxh = jax.random.uniform(next(ki), (input_size, hidden_size),
                                 jnp.float32, -0.1, 0.1)
        bxh = jax.random.uniform(next(ki), (1, hidden_size),
                                 jnp.float32, -0.1, 0.1)
        layers.append((whh, bhh, wxh, bxh))
        input_size = hidden_size
    params["layers"] = layers
    # _output_layer: weight ~ U(-0.1, 0.1), bias zeroed (init_weights_uniform).
    params["wout"] = jax.random.uniform(next(ki), (hidden_size, vocab_size),
                                        jnp.float32, -0.1, 0.1)
    params["bout"] = jnp.zeros((1, vocab_size), jnp.float32)
    return params


if __name__ == "__main__":
    emb_size = 64
    hidden_size = 128
    seq_len = 8
    batch_size = 8
    vocab_size = 256
    num_layers = 2
    # dp_keep_prob = 1.0  -> dropout is the identity.

    key = jax.random.PRNGKey(0)
    k_params, k_tokens = jax.random.split(key)
    params = init_params(k_params, emb_size=emb_size, hidden_size=hidden_size,
                         vocab_size=vocab_size, num_layers=num_layers)

    tokens = jax.random.randint(k_tokens, (seq_len, batch_size), 0, vocab_size,
                                dtype=jnp.int32)
    h0 = jnp.zeros((num_layers, batch_size, hidden_size), jnp.float32)

    logits, h_final = rnn_forward_pallas(
        tokens, h0, params,
        emb_size=emb_size, hidden_size=hidden_size,
        vocab_size=vocab_size, num_layers=num_layers)
    logits = jax.block_until_ready(logits)
    h_final = jax.block_until_ready(h_final)

    logits_ref, h_ref = rnn_forward_ref(tokens, h0, params, emb_size=emb_size)

    assert logits.shape == (seq_len, batch_size, vocab_size)
    assert h_final.shape == (num_layers, batch_size, hidden_size)
    assert jnp.allclose(logits, logits_ref, atol=1e-4, rtol=1e-4), "logits mismatch"
    assert jnp.allclose(h_final, h_ref, atol=1e-4, rtol=1e-4), "hidden mismatch"

    print("KERNEL_OK")
</pallas_src>

<mosaic_0001>
module attributes {stable_mosaic.version = 11 : i64} {
  func.func @_rnn_core_kernel(%arg0: i32, %arg1: memref<8x8x128xf32, #tpu.memory_space<vmem>>, %arg2: memref<2x8x128xf32, #tpu.memory_space<vmem>>, %arg3: memref<128x128xf32, #tpu.memory_space<vmem>>, %arg4: memref<1x128xf32, #tpu.memory_space<vmem>>, %arg5: memref<256x128xf32, #tpu.memory_space<vmem>>, %arg6: memref<1x128xf32, #tpu.memory_space<vmem>>, %arg7: memref<8x8x128xf32, #tpu.memory_space<vmem>>, %arg8: memref<2x8x128xf32, #tpu.memory_space<vmem>>) attributes {dimension_semantics = [#tpu.dimension_semantics<arbitrary>], iteration_bounds = array<i64: 1>, scalar_prefetch = 0 : i64, scratch_operands = 0 : i64, tpu.core_type = #tpu.core_type<tc>, window_params = [{transform_indices = @transform_0, window_bounds = array<i64: 8, 8, 128>}, {pipeline_mode = #tpu.pipeline_mode<synchronous>, transform_indices = @transform_1, window_bounds = array<i64: 2, 8, 128>}, {pipeline_mode = #tpu.pipeline_mode<synchronous>, transform_indices = @transform_2, window_bounds = array<i64: 128, 128>}, {pipeline_mode = #tpu.pipeline_mode<synchronous>, transform_indices = @transform_3, window_bounds = array<i64: 1, 128>}, {pipeline_mode = #tpu.pipeline_mode<synchronous>, transform_indices = @transform_4, window_bounds = array<i64: 256, 128>}, {pipeline_mode = #tpu.pipeline_mode<synchronous>, transform_indices = @transform_5, window_bounds = array<i64: 1, 128>}, {transform_indices = @transform_6, window_bounds = array<i64: 8, 8, 128>}, {pipeline_mode = #tpu.pipeline_mode<synchronous>, transform_indices = @transform_7, window_bounds = array<i64: 2, 8, 128>}]} {
    %c0_i32 = arith.constant 0 : i32
    %0 = arith.cmpi eq, %arg0, %c0_i32 : i32
    %1 = arith.extui %0 : i1 to i32
    %c0_i32_0 = arith.constant 0 : i32
    %2 = arith.cmpi ne, %1, %c0_i32_0 : i32
    scf.if %2 {
      %c0_67 = arith.constant 0 : index
      %c0_68 = arith.constant 0 : index
      %c0_69 = arith.constant 0 : index
      %153 = vector.load %arg2[%c0_67, %c0_68, %c0_69] : memref<2x8x128xf32, #tpu.memory_space<vmem>>, vector<2x8x128xf32>
      %c0_70 = arith.constant 0 : index
      %c0_71 = arith.constant 0 : index
      %c0_72 = arith.constant 0 : index
      %154 = vector.load %arg8[%c0_70, %c0_71, %c0_72] : memref<2x8x128xf32, #tpu.memory_space<vmem>>, vector<2x8x128xf32>
      tpu.vector_store %arg8[%c0_70, %c0_71, %c0_72], %153 {strides = array<i32>} : memref<2x8x128xf32, #tpu.memory_space<vmem>>, vector<2x8x128xf32>,
    } else {
    }
    %c0 = arith.constant 0 : index
    %c0_1 = arith.constant 0 : index
    %3 = vector.load %arg3[%c0, %c0_1] : memref<128x128xf32, #tpu.memory_space<vmem>>, vector<128x128xf32>
    %c0_2 = arith.constant 0 : index
    %c0_3 = arith.constant 0 : index
    %4 = vector.load %arg4[%c0_2, %c0_3] : memref<1x128xf32, #tpu.memory_space<vmem>>, vector<1x128xf32>
    %c0_4 = arith.constant 0 : index
    %c0_5 = arith.constant 0 : index
    %5 = vector.load %arg5[%c0_4, %c0_5] : memref<256x128xf32, #tpu.memory_space<vmem>>, vector<256x128xf32>
    %c0_6 = arith.constant 0 : index
    %c0_7 = arith.constant 0 : index
    %6 = vector.load %arg6[%c0_6, %c0_7] : memref<1x128xf32, #tpu.memory_space<vmem>>, vector<1x128xf32>
    %c0_8 = arith.constant 0 : index
    %c0_9 = arith.constant 0 : index
    %c0_10 = arith.constant 0 : index
    %7 = vector.load %arg8[%c0_8, %c0_9, %c0_10] : memref<2x8x128xf32, #tpu.memory_space<vmem>>, vector<1x8x128xf32>
    %8 = vector.shape_cast %7 : vector<1x8x128xf32> to vector<8x128xf32>
    %c1 = arith.constant 1 : index
    %c0_11 = arith.constant 0 : index
    %c0_12 = arith.constant 0 : index
    %9 = vector.load %arg8[%c1, %c0_11, %c0_12] : memref<2x8x128xf32, #tpu.memory_space<vmem>>, vector<1x8x128xf32>
    %10 = vector.shape_cast %9 : vector<1x8x128xf32> to vector<8x128xf32>
    %c0_i32_13 = arith.constant 0 : i32
    %11 = arith.index_cast %c0_i32_13 : i32 to index
    %c0_14 = arith.constant 0 : index
    %c0_15 = arith.constant 0 : index
    %12 = vector.load %arg1[%11, %c0_14, %c0_15] : memref<8x8x128xf32, #tpu.memory_space<vmem>>, vector<1x8x128xf32>
    %13 = vector.shape_cast %12 : vector<1x8x128xf32> to vector<8x128xf32>
    %cst = arith.constant dense<0.000000e+00> : vector<8x128xf32>
    %14 = tpu.matmul %8, %3, %cst {dimension_numbers = #tpu.dot_dimension_numbers<[1], [0], [0], [1], [0, 0, 1, 1], [], []>} : vector<8x128xf32>, vector<128x128xf32>, vector<8x128xf32> -> vector<8x128xf32>
    %15 = arith.addf %13, %14 : vector<8x128xf32>
    %16 = vector.broadcast %4 : vector<1x128xf32> to vector<8x128xf32>
    %17 = arith.addf %15, %16 : vector<8x128xf32>
    %18 = math.tanh %17 : vector<8x128xf32>
    %19 = tpu.concatenate %10, %18 in 1 : vector<8x128xf32>, vector<8x128xf32> -> vector<8x256xf32>
    %cst_16 = arith.constant dense<0.000000e+00> : vector<8x128xf32>
    %20 = tpu.matmul %19, %5, %cst_16 {dimension_numbers = #tpu.dot_dimension_numbers<[1], [0], [0], [1], [0, 0, 1, 1], [], []>} : vector<8x256xf32>, vector<256x128xf32>, vector<8x128xf32> -> vector<8x128xf32>
    %21 = vector.broadcast %6 : vector<1x128xf32> to vector<8x128xf32>
    %22 = arith.addf %20, %21 : vector<8x128xf32>
    %23 = math.tanh %22 : vector<8x128xf32>
    %24 = arith.index_cast %c0_i32_13 : i32 to index
    %c0_17 = arith.constant 0 : index
    %c0_18 = arith.constant 0 : index
    %25 = vector.load %arg7[%24, %c0_17, %c0_18] : memref<8x8x128xf32, #tpu.memory_space<vmem>>, vector<1x8x128xf32>
    %26 = vector.shape_cast %25 : vector<1x8x128xf32> to vector<8x128xf32>
    %27 = vector.shape_cast %23 : vector<8x128xf32> to vector<1x8x128xf32>
    tpu.vector_store %arg7[%24, %c0_17, %c0_18], %27 {strides = array<i32>} : memref<8x8x128xf32, #tpu.memory_space<vmem>>, vector<1x8x128xf32>,
    %c1_i32 = arith.constant 1 : i32
    %28 = arith.index_cast %c1_i32 : i32 to index
    %c0_19 = arith.constant 0 : index
    %c0_20 = arith.constant 0 : index
    %29 = vector.load %arg1[%28, %c0_19, %c0_20] : memref<8x8x128xf32, #tpu.memory_space<vmem>>, vector<1x8x128xf32>
    %30 = vector.shape_cast %29 : vector<1x8x128xf32> to vector<8x128xf32>
    %cst_21 = arith.constant dense<0.000000e+00> : vector<8x128xf32>
    %31 = tpu.matmul %18, %3, %cst_21 {dimension_numbers = #tpu.dot_dimension_numbers<[1], [0], [0], [1], [0, 0, 1, 1], [], []>} : vector<8x128xf32>, vector<128x128xf32>, vector<8x128xf32> -> vector<8x128xf32>
    %32 = arith.addf %30, %31 : vector<8x128xf32>
    %33 = vector.broadcast %4 : vector<1x128xf32> to vector<8x128xf32>
    %34 = arith.addf %32, %33 : vector<8x128xf32>
    %35 = math.tanh %34 : vector<8x128xf32>
    %36 = tpu.concatenate %23, %35 in 1 : vector<8x128xf32>, vector<8x128xf32> -> vector<8x256xf32>
    %cst_22 = arith.constant dense<0.000000e+00> : vector<8x128xf32>
    %37 = tpu.matmul %36, %5, %cst_22 {dimension_numbers = #tpu.dot_dimension_numbers<[1], [0], [0], [1], [0, 0, 1, 1], [], []>} : vector<8x256xf32>, vector<256x128xf32>, vector<8x128xf32> -> vector<8x128xf32>
    %38 = vector.broadcast %6 : vector<1x128xf32> to vector<8x128xf32>
    %39 = arith.addf %37, %38 : vector<8x128xf32>
    %40 = math.tanh %39 : vector<8x128xf32>
    %41 = arith.index_cast %c1_i32 : i32 to index
    %c0_23 = arith.constant 0 : index
    %c0_24 = arith.constant 0 : index
    %42 = vector.load %arg7[%41, %c0_23, %c0_24] : memref<8x8x128xf32, #tpu.memory_space<vmem>>, vector<1x8x128xf32>
    %43 = vector.shape_cast %42 : vector<1x8x128xf32> to vector<8x128xf32>
    %44 = vector.shape_cast %40 : vector<8x128xf32> to vector<1x8x128xf32>
    tpu.vector_store %arg7[%41, %c0_23, %c0_24], %44 {strides = array<i32>} : memref<8x8x128xf32, #tpu.memory_space<vmem>>, vector<1x8x128xf32>,
    %c2_i32 = arith.constant 2 : i32
    %45 = arith.index_cast %c2_i32 : i32 to index
    %c0_25 = arith.constant 0 : index
    %c0_26 = arith.constant 0 : index
    %46 = vector.load %arg1[%45, %c0_25, %c0_26] : memref<8x8x128xf32, #tpu.memory_space<vmem>>, vector<1x8x128xf32>
    %47 = vector.shape_cast %46 : vector<1x8x128xf32> to vector<8x128xf32>
    %cst_27 = arith.constant dense<0.000000e+00> : vector<8x128xf32>
    %48 = tpu.matmul %35, %3, %cst_27 {dimension_numbers = #tpu.dot_dimension_numbers<[1], [0], [0], [1], [0, 0, 1, 1], [], []>} : vector<8x128xf32>, vector<128x128xf32>, vector<8x128xf32> -> vector<8x128xf32>
    %49 = arith.addf %47, %48 : vector<8x128xf32>
    %50 = vector.broadcast %4 : vector<1x128xf32> to vector<8x128xf32>
    %51 = arith.addf %49, %50 : vector<8x128xf32>
    %52 = math.tanh %51 : vector<8x128xf32>
    %53 = tpu.concatenate %40, %52 in 1 : vector<8x128xf32>, vector<8x128xf32> -> vector<8x256xf32>
    %cst_28 = arith.constant dense<0.000000e+00> : vector<8x128xf32>
    %54 = tpu.matmul %53, %5, %cst_28 {dimension_numbers = #tpu.dot_dimension_numbers<[1], [0], [0], [1], [0, 0, 1, 1], [], []>} : vector<8x256xf32>, vector<256x128xf32>, vector<8x128xf32> -> vector<8x128xf32>
    %55 = vector.broadcast %6 : vector<1x128xf32> to vector<8x128xf32>
    %56 = arith.addf %54, %55 : vector<8x128xf32>
    %57 = math.tanh %56 : vector<8x128xf32>
    %58 = arith.index_cast %c2_i32 : i32 to index
    %c0_29 = arith.constant 0 : index
    %c0_30 = arith.constant 0 : index
    %59 = vector.load %arg7[%58, %c0_29, %c0_30] : memref<8x8x128xf32, #tpu.memory_space<vmem>>, vector<1x8x128xf32>
    %60 = vector.shape_cast %59 : vector<1x8x128xf32> to vector<8x128xf32>
    %61 = vector.shape_cast %57 : vector<8x128xf32> to vector<1x8x128xf32>
    tpu.vector_store %arg7[%58, %c0_29, %c0_30], %61 {strides = array<i32>} : memref<8x8x128xf32, #tpu.memory_space<vmem>>, vector<1x8x128xf32>,
    %c3_i32 = arith.constant 3 : i32
    %62 = arith.index_cast %c3_i32 : i32 to index
    %c0_31 = arith.constant 0 : index
    %c0_32 = arith.constant 0 : index
    %63 = vector.load %arg1[%62, %c0_31, %c0_32] : memref<8x8x128xf32, #tpu.memory_space<vmem>>, vector<1x8x128xf32>
    %64 = vector.shape_cast %63 : vector<1x8x128xf32> to vector<8x128xf32>
    %cst_33 = arith.constant dense<0.000000e+00> : vector<8x128xf32>
    %65 = tpu.matmul %52, %3, %cst_33 {dimension_numbers = #tpu.dot_dimension_numbers<[1], [0], [0], [1], [0, 0, 1, 1], [], []>} : vector<8x128xf32>, vector<128x128xf32>, vector<8x128xf32> -> vector<8x128xf32>
    %66 = arith.addf %64, %65 : vector<8x128xf32>
    %67 = vector.broadcast %4 : vector<1x128xf32> to vector<8x128xf32>
    %68 = arith.addf %66, %67 : vector<8x128xf32>
    %69 = math.tanh %68 : vector<8x128xf32>
    %70 = tpu.concatenate %57, %69 in 1 : vector<8x128xf32>, vector<8x128xf32> -> vector<8x256xf32>
    %cst_34 = arith.constant dense<0.000000e+00> : vector<8x128xf32>
    %71 = tpu.matmul %70, %5, %cst_34 {dimension_numbers = #tpu.dot_dimension_numbers<[1], [0], [0], [1], [0, 0, 1, 1], [], []>} : vector<8x256xf32>, vector<256x128xf32>, vector<8x128xf32> -> vector<8x128xf32>
    %72 = vector.broadcast %6 : vector<1x128xf32> to vector<8x128xf32>
    %73 = arith.addf %71, %72 : vector<8x128xf32>
    %74 = math.tanh %73 : vector<8x128xf32>
    %75 = arith.index_cast %c3_i32 : i32 to index
    %c0_35 = arith.constant 0 : index
    %c0_36 = arith.constant 0 : index
    %76 = vector.load %arg7[%75, %c0_35, %c0_36] : memref<8x8x128xf32, #tpu.memory_space<vmem>>, vector<1x8x128xf32>
    %77 = vector.shape_cast %76 : vector<1x8x128xf32> to vector<8x128xf32>
    %78 = vector.shape_cast %74 : vector<8x128xf32> to vector<1x8x128xf32>
    tpu.vector_store %arg7[%75, %c0_35, %c0_36], %78 {strides = array<i32>} : memref<8x8x128xf32, #tpu.memory_space<vmem>>, vector<1x8x128xf32>,
    %c4_i32 = arith.constant 4 : i32
    %79 = arith.index_cast %c4_i32 : i32 to index
    %c0_37 = arith.constant 0 : index
    %c0_38 = arith.constant 0 : index
    %80 = vector.load %arg1[%79, %c0_37, %c0_38] : memref<8x8x128xf32, #tpu.memory_space<vmem>>, vector<1x8x128xf32>
    %81 = vector.shape_cast %80 : vector<1x8x128xf32> to vector<8x128xf32>
    %cst_39 = arith.constant dense<0.000000e+00> : vector<8x128xf32>
    %82 = tpu.matmul %69, %3, %cst_39 {dimension_numbers = #tpu.dot_dimension_numbers<[1], [0], [0], [1], [0, 0, 1, 1], [], []>} : vector<8x128xf32>, vector<128x128xf32>, vector<8x128xf32> -> vector<8x128xf32>
    %83 = arith.addf %81, %82 : vector<8x128xf32>
    %84 = vector.broadcast %4 : vector<1x128xf32> to vector<8x128xf32>
    %85 = arith.addf %83, %84 : vector<8x128xf32>
    %86 = math.tanh %85 : vector<8x128xf32>
    %87 = tpu.concatenate %74, %86 in 1 : vector<8x128xf32>, vector<8x128xf32> -> vector<8x256xf32>
    %cst_40 = arith.constant dense<0.000000e+00> : vector<8x128xf32>
    %88 = tpu.matmul %87, %5, %cst_40 {dimension_numbers = #tpu.dot_dimension_numbers<[1], [0], [0], [1], [0, 0, 1, 1], [], []>} : vector<8x256xf32>, vector<256x128xf32>, vector<8x128xf32> -> vector<8x128xf32>
    %89 = vector.broadcast %6 : vector<1x128xf32> to vector<8x128xf32>
    %90 = arith.addf %88, %89 : vector<8x128xf32>
    %91 = math.tanh %90 : vector<8x128xf32>
    %92 = arith.index_cast %c4_i32 : i32 to index
    %c0_41 = arith.constant 0 : index
    %c0_42 = arith.constant 0 : index
    %93 = vector.load %arg7[%92, %c0_41, %c0_42] : memref<8x8x128xf32, #tpu.memory_space<vmem>>, vector<1x8x128xf32>
    %94 = vector.shape_cast %93 : vector<1x8x128xf32> to vector<8x128xf32>
    %95 = vector.shape_cast %91 : vector<8x128xf32> to vector<1x8x128xf32>
    tpu.vector_store %arg7[%92, %c0_41, %c0_42], %95 {strides = array<i32>} : memref<8x8x128xf32, #tpu.memory_space<vmem>>, vector<1x8x128xf32>,
    %c5_i32 = arith.constant 5 : i32
    %96 = arith.index_cast %c5_i32 : i32 to index
    %c0_43 = arith.constant 0 : index
    %c0_44 = arith.constant 0 : index
    %97 = vector.load %arg1[%96, %c0_43, %c0_44] : memref<8x8x128xf32, #tpu.memory_space<vmem>>, vector<1x8x128xf32>
    %98 = vector.shape_cast %97 : vector<1x8x128xf32> to vector<8x128xf32>
    %cst_45 = arith.constant dense<0.000000e+00> : vector<8x128xf32>
    %99 = tpu.matmul %86, %3, %cst_45 {dimension_numbers = #tpu.dot_dimension_numbers<[1], [0], [0], [1], [0, 0, 1, 1], [], []>} : vector<8x128xf32>, vector<128x128xf32>, vector<8x128xf32> -> vector<8x128xf32>
    %100 = arith.addf %98, %99 : vector<8x128xf32>
    %101 = vector.broadcast %4 : vector<1x128xf32> to vector<8x128xf32>
    %102 = arith.addf %100, %101 : vector<8x128xf32>
    %103 = math.tanh %102 : vector<8x128xf32>
    %104 = tpu.concatenate %91, %103 in 1 : vector<8x128xf32>, vector<8x128xf32> -> vector<8x256xf32>
    %cst_46 = arith.constant dense<0.000000e+00> : vector<8x128xf32>
    %105 = tpu.matmul %104, %5, %cst_46 {dimension_numbers = #tpu.dot_dimension_numbers<[1], [0], [0], [1], [0, 0, 1, 1], [], []>} : vector<8x256xf32>, vector<256x128xf32>, vector<8x128xf32> -> vector<8x128xf32>
    %106 = vector.broadcast %6 : vector<1x128xf32> to vector<8x128xf32>
    %107 = arith.addf %105, %106 : vector<8x128xf32>
    %108 = math.tanh %107 : vector<8x128xf32>
    %109 = arith.index_cast %c5_i32 : i32 to index
    %c0_47 = arith.constant 0 : index
    %c0_48 = arith.constant 0 : index
    %110 = vector.load %arg7[%109, %c0_47, %c0_48] : memref<8x8x128xf32, #tpu.memory_space<vmem>>, vector<1x8x128xf32>
    %111 = vector.shape_cast %110 : vector<1x8x128xf32> to vector<8x128xf32>
    %112 = vector.shape_cast %108 : vector<8x128xf32> to vector<1x8x128xf32>
    tpu.vector_store %arg7[%109, %c0_47, %c0_48], %112 {strides = array<i32>} : memref<8x8x128xf32, #tpu.memory_space<vmem>>, vector<1x8x128xf32>,
    %c6_i32 = arith.constant 6 : i32
    %113 = arith.index_cast %c6_i32 : i32 to index
    %c0_49 = arith.constant 0 : index
    %c0_50 = arith.constant 0 : index
    %114 = vector.load %arg1[%113, %c0_49, %c0_50] : memref<8x8x128xf32, #tpu.memory_space<vmem>>, vector<1x8x128xf32>
    %115 = vector.shape_cast %114 : vector<1x8x128xf32> to vector<8x128xf32>
    %cst_51 = arith.constant dense<0.000000e+00> : vector<8x128xf32>
    %116 = tpu.matmul %103, %3, %cst_51 {dimension_numbers = #tpu.dot_dimension_numbers<[1], [0], [0], [1], [0, 0, 1, 1], [], []>} : vector<8x128xf32>, vector<128x128xf32>, vector<8x128xf32> -> vector<8x128xf32>
    %117 = arith.addf %115, %116 : vector<8x128xf32>
    %118 = vector.broadcast %4 : vector<1x128xf32> to vector<8x128xf32>
    %119 = arith.addf %117, %118 : vector<8x128xf32>
    %120 = math.tanh %119 : vector<8x128xf32>
    %121 = tpu.concatenate %108, %120 in 1 : vector<8x128xf32>, vector<8x128xf32> -> vector<8x256xf32>
    %cst_52 = arith.constant dense<0.000000e+00> : vector<8x128xf32>
    %122 = tpu.matmul %121, %5, %cst_52 {dimension_numbers = #tpu.dot_dimension_numbers<[1], [0], [0], [1], [0, 0, 1, 1], [], []>} : vector<8x256xf32>, vector<256x128xf32>, vector<8x128xf32> -> vector<8x128xf32>
    %123 = vector.broadcast %6 : vector<1x128xf32> to vector<8x128xf32>
    %124 = arith.addf %122, %123 : vector<8x128xf32>
    %125 = math.tanh %124 : vector<8x128xf32>
    %126 = arith.index_cast %c6_i32 : i32 to index
    %c0_53 = arith.constant 0 : index
    %c0_54 = arith.constant 0 : index
    %127 = vector.load %arg7[%126, %c0_53, %c0_54] : memref<8x8x128xf32, #tpu.memory_space<vmem>>, vector<1x8x128xf32>
    %128 = vector.shape_cast %127 : vector<1x8x128xf32> to vector<8x128xf32>
    %129 = vector.shape_cast %125 : vector<8x128xf32> to vector<1x8x128xf32>
    tpu.vector_store %arg7[%126, %c0_53, %c0_54], %129 {strides = array<i32>} : memref<8x8x128xf32, #tpu.memory_space<vmem>>, vector<1x8x128xf32>,
    %c7_i32 = arith.constant 7 : i32
    %130 = arith.index_cast %c7_i32 : i32 to index
    %c0_55 = arith.constant 0 : index
    %c0_56 = arith.constant 0 : index
    %131 = vector.load %arg1[%130, %c0_55, %c0_56] : memref<8x8x128xf32, #tpu.memory_space<vmem>>, vector<1x8x128xf32>
    %132 = vector.shape_cast %131 : vector<1x8x128xf32> to vector<8x128xf32>
    %cst_57 = arith.constant dense<0.000000e+00> : vector<8x128xf32>
    %133 = tpu.matmul %120, %3, %cst_57 {dimension_numbers = #tpu.dot_dimension_numbers<[1], [0], [0], [1], [0, 0, 1, 1], [], []>} : vector<8x128xf32>, vector<128x128xf32>, vector<8x128xf32> -> vector<8x128xf32>
    %134 = arith.addf %132, %133 : vector<8x128xf32>
    %135 = vector.broadcast %4 : vector<1x128xf32> to vector<8x128xf32>
    %136 = arith.addf %134, %135 : vector<8x128xf32>
    %137 = math.tanh %136 : vector<8x128xf32>
    %138 = tpu.concatenate %125, %137 in 1 : vector<8x128xf32>, vector<8x128xf32> -> vector<8x256xf32>
    %cst_58 = arith.constant dense<0.000000e+00> : vector<8x128xf32>
    %139 = tpu.matmul %138, %5, %cst_58 {dimension_numbers = #tpu.dot_dimension_numbers<[1], [0], [0], [1], [0, 0, 1, 1], [], []>} : vector<8x256xf32>, vector<256x128xf32>, vector<8x128xf32> -> vector<8x128xf32>
    %140 = vector.broadcast %6 : vector<1x128xf32> to vector<8x128xf32>
    %141 = arith.addf %139, %140 : vector<8x128xf32>
    %142 = math.tanh %141 : vector<8x128xf32>
    %143 = arith.index_cast %c7_i32 : i32 to index
    %c0_59 = arith.constant 0 : index
    %c0_60 = arith.constant 0 : index
    %144 = vector.load %arg7[%143, %c0_59, %c0_60] : memref<8x8x128xf32, #tpu.memory_space<vmem>>, vector<1x8x128xf32>
    %145 = vector.shape_cast %144 : vector<1x8x128xf32> to vector<8x128xf32>
    %146 = vector.shape_cast %142 : vector<8x128xf32> to vector<1x8x128xf32>
    tpu.vector_store %arg7[%143, %c0_59, %c0_60], %146 {strides = array<i32>} : memref<8x8x128xf32, #tpu.memory_space<vmem>>, vector<1x8x128xf32>,
    %c8_i32 = arith.constant 8 : i32
    %c0_61 = arith.constant 0 : index
    %c0_62 = arith.constant 0 : index
    %c0_63 = arith.constant 0 : index
    %147 = vector.load %arg8[%c0_61, %c0_62, %c0_63] : memref<2x8x128xf32, #tpu.memory_space<vmem>>, vector<1x8x128xf32>
    %148 = vector.shape_cast %147 : vector<1x8x128xf32> to vector<8x128xf32>
    %149 = vector.shape_cast %137 : vector<8x128xf32> to vector<1x8x128xf32>
    tpu.vector_store %arg8[%c0_61, %c0_62, %c0_63], %149 {strides = array<i32>} : memref<2x8x128xf32, #tpu.memory_space<vmem>>, vector<1x8x128xf32>,
    %c1_64 = arith.constant 1 : index
    %c0_65 = arith.constant 0 : index
    %c0_66 = arith.constant 0 : index
    %150 = vector.load %arg8[%c1_64, %c0_65, %c0_66] : memref<2x8x128xf32, #tpu.memory_space<vmem>>, vector<1x8x128xf32>
    %151 = vector.shape_cast %150 : vector<1x8x128xf32> to vector<8x128xf32>
    %152 = vector.shape_cast %142 : vector<8x128xf32> to vector<1x8x128xf32>
    tpu.vector_store %arg8[%c1_64, %c0_65, %c0_66], %152 {strides = array<i32>} : memref<2x8x128xf32, #tpu.memory_space<vmem>>, vector<1x8x128xf32>,
    return
  }
  func.func @transform_0(%arg0: i32) -> (i32, i32, i32) {
    %c0_i32 = arith.constant 0 : i32
    %c0_i32_0 = arith.constant 0 : i32
    %c0_i32_1 = arith.constant 0 : i32
    return %arg0, %c0_i32, %c0_i32_0 : i32, i32, i32
  }
  func.func @transform_1(%arg0: i32) -> (i32, i32, i32) {
    %c0_i32 = arith.constant 0 : i32
    %c0_i32_0 = arith.constant 0 : i32
    %c0_i32_1 = arith.constant 0 : i32
    %c0_i32_2 = arith.constant 0 : i32
    return %c0_i32, %c0_i32_0, %c0_i32_1 : i32, i32, i32
  }
  func.func @transform_2(%arg0: i32) -> (i32, i32) {
    %c0_i32 = arith.constant 0 : i32
    %c0_i32_0 = arith.constant 0 : i32
    %c0_i32_1 = arith.constant 0 : i32
    return %c0_i32, %c0_i32_0 : i32, i32
  }
  func.func @transform_3(%arg0: i32) -> (i32, i32) {
    %c0_i32 = arith.constant 0 : i32
    %c0_i32_0 = arith.constant 0 : i32
    %c0_i32_1 = arith.constant 0 : i32
    return %c0_i32, %c0_i32_0 : i32, i32
  }
  func.func @transform_4(%arg0: i32) -> (i32, i32) {
    %c0_i32 = arith.constant 0 : i32
    %c0_i32_0 = arith.constant 0 : i32
    %c0_i32_1 = arith.constant 0 : i32
    return %c0_i32, %c0_i32_0 : i32, i32
  }
  func.func @transform_5(%arg0: i32) -> (i32, i32) {
    %c0_i32 = arith.constant 0 : i32
    %c0_i32_0 = arith.constant 0 : i32
    %c0_i32_1 = arith.constant 0 : i32
    return %c0_i32, %c0_i32_0 : i32, i32
  }
  func.func @transform_6(%arg0: i32) -> (i32, i32, i32) {
    %c0_i32 = arith.constant 0 : i32
    %c0_i32_0 = arith.constant 0 : i32
    %c0_i32_1 = arith.constant 0 : i32
    return %arg0, %c0_i32, %c0_i32_0 : i32, i32, i32
  }
  func.func @transform_7(%arg0: i32) -> (i32, i32, i32) {
    %c0_i32 = arith.constant 0 : i32
    %c0_i32_0 = arith.constant 0 : i32
    %c0_i32_1 = arith.constant 0 : i32
    %c0_i32_2 = arith.constant 0 : i32
    return %c0_i32, %c0_i32_0, %c0_i32_1 : i32, i32, i32
  }
}

</mosaic_0001>

<bundles_post_ra>
// kernel: tpu_custom_call.1
= control target key start
LH: loop header
LB: loop body
LE: loop exit
PB: predicated region body
PF: predicated region fallthrough
CT: control target
= control target key end

     0   :  { %13 = vsyncpa [#allocation3], 0  ;;  %s3019_s0 = inlined_call_operand.hbm [shape: f32[8,8,128], index: 0, kind: input, shape index: {}]   ;;  %s3020_s1 = inlined_call_operand.hbm [shape: f32[2,8,128], index: 1, kind: input, shape index: {}]   ;;  %s3021_s2 = inlined_call_operand.hbm [shape: f32[128,128], index: 2, kind: input, shape index: {}]   ;;  %s3022_s3 = inlined_call_operand.vmem [shape: f32[1,128], index: 3, kind: input, shape index: {}]   ;;  %s3023_s4 = inlined_call_operand.hbm [shape: f32[256,128], index: 4, kind: input, shape index: {}]   ;;  %s3024_s5 = inlined_call_operand.vmem [shape: f32[1,128], index: 5, kind: input, shape index: {}]   ;;  %s3025_s6 = inlined_call_operand.hbm [shape: f32[8,8,128], index: 6, kind: output, shape index: {0}]   ;;  %s3026_s7 = inlined_call_operand.hbm [shape: f32[2,8,128], index: 7, kind: output, shape index: {1}]  }
   0x1   :  { %14 = vsyncpa [#allocation6], 0 }
   0x2   :  { %15 = vsyncpa [#allocation9], 0 }
   0x3   :  { %16 = vsyncpa [#allocation4], 0 }
   0x4   :  { %17 = vsyncpa [#allocation12], 0  ;;  %s2293_s24 = smov [#allocation5]   ;;  %s2294_s26 = smov [#allocation2]  }
   0x5   :  { %s35_s25 = sshll.u32 %s2293_s24, 4  ;;  %s23_s27 = sshll.u32 %s2294_s26, 4  ;;  %s36_s25 = int_to_ptr.vmem [resolvable:$true] %s35_s25  ;;  %s24_s27 = int_to_ptr.vmem [resolvable:$true] %s23_s27 }
   0x6   :  { %s2171_s28 = scalar_lea.vmem %s36_s25, 256  ;;  %p2176_p1 = scmp.lt.s32.totalorder %s36_s25, %s36_s25 }
   0x7   :  { %p2172_p0 = scmp.ne.s32.totalorder %s36_s25, %s2171_s28  ;;  %p2177_p2 = scmp.lt.s32.totalorder %s2171_s28, %s2171_s28 }
   0x9   :  { %p2178_p3 = por %p2177_p2, %p2176_p1 }
   0xb   :  { %p2179_p4 = pnand %p2178_p3, %p2172_p0 }
   0xd   :  { %2182 = shalt.err (!%p2179_p4)
}
   0xe   :  { %s2295_s29 = smov 128   ;;  %s2296_s30 = smov 8  }
   0xf   :  { %41 = dma.hbm_to_vmem [thread:$0]  %s3020_s1, 256, %s36_s25, [#allocation6], %s2295_s29, %s2295_s29, %s2296_s30  }
  0x10   :  { %s2191_s10 = scalar_lea.vmem %s24_s27, 1024  ;;  %p2196_p6 = scmp.lt.s32.totalorder %s24_s27, %s24_s27 }
  0x11   :  { %p2192_p5 = scmp.ne.s32.totalorder %s24_s27, %s2191_s10  ;;  %p2197_p7 = scmp.lt.s32.totalorder %s2191_s10, %s2191_s10 }
  0x13   :  { %p2198_p8 = por %p2197_p7, %p2196_p6 }
  0x15   :  { %p2199_p9 = pnand %p2198_p8, %p2192_p5 }
  0x17   :  { %2202 = shalt.err (!%p2199_p9)
}
  0x18   :  { %29 = dma.hbm_to_vmem [thread:$0]  %s3019_s0, 1024, %s24_s27, [#allocation3], %s2295_s29, %s2295_s29, %s2296_s30  }
  0x19   :  { %s2297_s13 = smov [#allocation7]   ;;  %s2298_s15 = smov [#allocation8]  }
  0x1a   :  { %s47_s14 = sshll.u32 %s2297_s13, 4  ;;  %s61_s16 = sshll.u32 %s2298_s15, 4  ;;  %s48_s14 = int_to_ptr.vmem [resolvable:$true] %s47_s14  ;;  %s62_s16 = int_to_ptr.vmem [resolvable:$true] %s61_s16 }
  0x1b   :  { %s2211_s1 = scalar_lea.vmem %s48_s14, 2048  ;;  %p2216_p11 = scmp.lt.s32.totalorder %s48_s14, %s48_s14 }
  0x1c   :  { %p2212_p10 = scmp.ne.s32.totalorder %s48_s14, %s2211_s1  ;;  %p2217_p12 = scmp.lt.s32.totalorder %s2211_s1, %s2211_s1 }
  0x1e   :  { %p2218_p13 = por %p2217_p12, %p2216_p11 }
  0x20   :  { %p2219_p0 = pnand %p2218_p13, %p2212_p10 }
  0x22   :  { %2222 = shalt.err (!%p2219_p0)
}
  0x23   :  { %53 = dma.hbm_to_vmem [thread:$0]  %s3021_s2, 2048, %s48_s14, [#allocation6], %s2295_s29, %s2295_s29, %s2296_s30  }
  0x24   :  { %s2231_s0 = scalar_lea.vmem %s62_s16, 4096  ;;  %p2236_p2 = scmp.lt.s32.totalorder %s62_s16, %s62_s16 }
  0x25   :  { %p2232_p1 = scmp.ne.s32.totalorder %s62_s16, %s2231_s0  ;;  %p2237_p3 = scmp.lt.s32.totalorder %s2231_s0, %s2231_s0 }
  0x27   :  { %p2238_p4 = por %p2237_p3, %p2236_p2 }
  0x29   :  { %p2239_p5 = pnand %p2238_p4, %p2232_p1 }
  0x2b   :  { %2242 = shalt.err (!%p2239_p5)
}
  0x2c   :  { %67 = dma.hbm_to_vmem [thread:$0]  %s3023_s4, 4096, %s62_s16, [#allocation9], %s2295_s29, %s2295_s29, %s2296_s30  }
  0x2d   :  { %2283 = dma.done.wait [#allocation3], 1024  }
  0x2e   :  { %2284 = vsyncadd [#allocation3], 4294966272 }
  0x2f   :  { %2285 = dma.done.wait [#allocation6], 2304  }
  0x30   :  { %2286 = vsyncadd [#allocation6], 4294964992 }
  0x31   :  { %2287 = dma.done.wait [#allocation9], 4096  }
  0x32   :  { %2288 = vsyncadd [#allocation9], 4294963200  ;;  %v2299_v0 = vmov 0.0   ;;  %vm2300_vm0 = vmmov 0   ;;  %v2370_v1 = vld [vmem:[#allocation7 + $0x78] sm:$0xff]  ;;  %v2372_v2 = vld [vmem:[#allocation7 + $0x70] sm:$0xff] }
  0x33   :  { %1792 = vmatprep.subr.mxu0 %v2299_v0  ;;  %1824 = vmatprep.mubr.msk.f32.mxu0 %vm2300_vm0, %v2299_v0  ;;  %v2376_v3 = vld [vmem:[#allocation7 + $0x68] sm:$0xff]  ;;  %v2380_v4 = vld [vmem:[#allocation7 + $0x60] sm:$0xff]  ;;  %v2383_v5 = vld [vmem:[#allocation7 + $0x58] sm:$0xff]  ;;  %s2302_s25 = smov [#allocation11]  }
  0x34   :  { %1793 = vmatpush3.msra.mxu0 %v2370_v1  ;;  %v2385_v6 = vld [vmem:[#allocation8 + $0xf8] sm:$0xff]  ;;  %v2391_v8 = vld [vmem:[#allocation8 + $0xf0] sm:$0xff]  ;;  %v2397_v10 = vld [vmem:[#allocation8 + $0xe8] sm:$0xff]  ;;  %s1356_s26 = sshll.u32 %s2302_s25, 4  ;;  %s1357_s26 = int_to_ptr.vmem [resolvable:$true] %s1356_s26 }
  0x35   :  { %1794 = vmatprep.subr.mxu0 %v2299_v0  ;;  %1393 = vmatprep.subr.mxu1 %v2385_v6  ;;  %v2389_v7 = vld [vmem:[#allocation8 + $0x78] sm:$0xff]  ;;  %v2393_v9 = vld [vmem:[#allocation8 + $0x70] sm:$0xff]  ;;  %v2403_v12 = vld [vmem:[#allocation8 + $0x68] sm:$0xff] }
  0x36   :  { %1795 = vmatpush3.msra.mxu0 %v2372_v2  ;;  %1394 = vmatpush3.msra.mxu1 %v2389_v7  ;;  %v2400_v11 = vld [vmem:[#allocation7 + $0x50] sm:$0xff]  ;;  %v2407_v13 = vld [vmem:[#allocation8 + $0xe0] sm:$0xff]  ;;  %v2410_v14 = vld [vmem:[#allocation7 + $0x48] sm:$0xff] }
  0x37   :  { %1796 = vmatprep.subr.mxu0 %v2299_v0  ;;  %1395 = vmatprep.subr.mxu1 %v2391_v8  ;;  %v2413_v15 = vld [vmem:[#allocation8 + $0x60] sm:$0xff]  ;;  %v2417_v16 = vld [vmem:[#allocation8 + $0xd8] sm:$0xff]  ;;  %v2427_v19 = vld [vmem:[#allocation8 + $0xd0] sm:$0xff] }
  0x38   :  { %1797 = vmatpush3.msra.mxu0 %v2376_v3  ;;  %1396 = vmatpush3.msra.mxu1 %v2393_v9  ;;  %v2420_v17 = vld [vmem:[#allocation7 + $0x40] sm:$0xff]  ;;  %v2423_v18 = vld [vmem:[#allocation8 + $0x58] sm:$0xff]  ;;  %v2433_v21 = vld [vmem:[#allocation8 + $0x50] sm:$0xff] }
  0x39   :  { %1798 = vmatprep.subr.mxu0 %v2299_v0  ;;  %1397 = vmatprep.subr.mxu1 %v2397_v10  ;;  %v2430_v20 = vld [vmem:[#allocation7 + $0x38] sm:$0xff]  ;;  %v2438_v22 = vld [vmem:[#allocation7 + $0x30] sm:$0xff]  ;;  %v2444_v23 = vld [vmem:[#allocation7 + $0x28] sm:$0xff] }
  0x3a   :  { %1799 = vmatpush3.msra.mxu0 %v2380_v4  ;;  %1398 = vmatpush3.msra.mxu1 %v2403_v12  ;;  %v2448_v24 = vld [vmem:[#allocation7 + $0x20] sm:$0xff]  ;;  %v2452_v25 = vld [vmem:[#allocation7 + $0x18] sm:$0xff]  ;;  %v2456_v26 = vld [vmem:[#allocation7 + $0x10] sm:$0xff] }
  0x3b   :  { %1800 = vmatprep.subr.mxu0 %v2299_v0  ;;  %1399 = vmatprep.subr.mxu1 %v2407_v13  ;;  %v2460_v27 = vld [vmem:[#allocation7 + $0x8] sm:$0xff]  ;;  %v2464_v28 = vld [vmem:[#allocation7] sm:$0xff]  ;;  %v86_v29 = vld [vmem:[#allocation5] sm:$0xff] }
  0x3c   :  { %1801 = vmatpush3.msra.mxu0 %v2383_v5  ;;  %1400 = vmatpush3.msra.mxu1 %v2413_v15  ;;  %v2504_v30 = vld [vmem:[#allocation8 + $0xc8] sm:$0xff]  ;;  %v2510_v32 = vld [vmem:[#allocation8 + $0xc0] sm:$0xff]  ;;  %v2516_v34 = vld [vmem:[#allocation8 + $0xb8] sm:$0xff] }
  0x3d   :  { %1802 = vmatprep.subr.mxu0 %v2299_v0  ;;  %1401 = vmatprep.subr.mxu1 %v2417_v16  ;;  %v2507_v31 = vld [vmem:[#allocation8 + $0x48] sm:$0xff]  ;;  %v2513_v33 = vld [vmem:[#allocation8 + $0x40] sm:$0xff]  ;;  %v2519_v35 = vld [vmem:[#allocation8 + $0x38] sm:$0xff] }
  0x3e   :  { %1803 = vmatpush3.msra.mxu0 %v2400_v11  ;;  %1402 = vmatpush3.msra.mxu1 %v2423_v18  ;;  %v2522_v36 = vld [vmem:[#allocation8 + $0xb0] sm:$0xff]  ;;  %v2526_v38 = vld [vmem:[#allocation8 + $0xa8] sm:$0xff]  ;;  %v2532_v40 = vld [vmem:[#allocation8 + $0xa0] sm:$0xff] }
  0x3f   :  { %1804 = vmatprep.subr.mxu0 %v2299_v0  ;;  %1403 = vmatprep.subr.mxu1 %v2427_v19  ;;  %v2524_v37 = vld [vmem:[#allocation8 + $0x30] sm:$0xff]  ;;  %v2529_v39 = vld [vmem:[#allocation8 + $0x28] sm:$0xff]  ;;  %v2535_v41 = vld [vmem:[#allocation8 + $0x20] sm:$0xff] }
  0x40   :  { %1805 = vmatpush3.msra.mxu0 %v2410_v14  ;;  %1404 = vmatpush3.msra.mxu1 %v2433_v21  ;;  %v2538_v42 = vld [vmem:[#allocation8 + $0x98] sm:$0xff]  ;;  %v2544_v44 = vld [vmem:[#allocation8 + $0x90] sm:$0xff]  ;;  %v2550_v46 = vld [vmem:[#allocation8 + $0x88] sm:$0xff] }
  0x41   :  { %1806 = vmatprep.subr.mxu0 %v2299_v0  ;;  %1405 = vmatprep.subr.mxu1 %v2504_v30  ;;  %v2541_v43 = vld [vmem:[#allocation8 + $0x18] sm:$0xff]  ;;  %v2547_v45 = vld [vmem:[#allocation8 + $0x10] sm:$0xff]  ;;  %v2553_v47 = vld [vmem:[#allocation8 + $0x8] sm:$0xff] }
  0x42   :  { %1807 = vmatpush3.msra.mxu0 %v2420_v17  ;;  %1406 = vmatpush3.msra.mxu1 %v2507_v31  ;;  %v2556_v48 = vld [vmem:[#allocation8 + $0x80] sm:$0xff]  ;;  %v143_v50 = vld [vmem:[#allocation2] sm:$0xff]  ;;  %v87_v56 = vld [vmem:[#allocation5 + $0x8] sm:$0xff] }
  0x43   :  { %1808 = vmatprep.subr.mxu0 %v2299_v0  ;;  %1407 = vmatprep.subr.mxu1 %v2510_v32  ;;  %v2559_v49 = vld [vmem:[#allocation8] sm:$0xff]  ;;  %v2568_v51 = vld [vmem:[%s3022_s3] ss:$0 sm:$0xff]  ;;  %v302_v58 = vld [vmem:[#allocation2 + $0x8] sm:$0xff] }
  0x44   :  { %1809 = vmatpush3.msra.mxu0 %v2430_v20  ;;  %1408 = vmatpush3.msra.mxu1 %v2513_v33 }
  0x45   :  { %1810 = vmatprep.subr.mxu0 %v2299_v0  ;;  %1409 = vmatprep.subr.mxu1 %v2516_v34 }
  0x46   :  { %1811 = vmatpush3.msra.mxu0 %v2438_v22  ;;  %1410 = vmatpush3.msra.mxu1 %v2519_v35 }
  0x47   :  { %1812 = vmatprep.subr.mxu0 %v2299_v0  ;;  %1411 = vmatprep.subr.mxu1 %v2522_v36 }
  0x48   :  { %1813 = vmatpush3.msra.mxu0 %v2444_v23  ;;  %1412 = vmatpush3.msra.mxu1 %v2524_v37 }
  0x49   :  { %1814 = vmatprep.subr.mxu0 %v2299_v0  ;;  %1413 = vmatprep.subr.mxu1 %v2526_v38 }
  0x4a   :  { %1815 = vmatpush3.msra.mxu0 %v2448_v24  ;;  %1414 = vmatpush3.msra.mxu1 %v2529_v39 }
  0x4b   :  { %1816 = vmatprep.subr.mxu0 %v2299_v0  ;;  %1415 = vmatprep.subr.mxu1 %v2532_v40 }
  0x4c   :  { %1817 = vmatpush3.msra.mxu0 %v2452_v25  ;;  %1416 = vmatpush3.msra.mxu1 %v2535_v41 }
  0x4d   :  { %1818 = vmatprep.subr.mxu0 %v2299_v0  ;;  %1417 = vmatprep.subr.mxu1 %v2538_v42 }
  0x4e   :  { %1819 = vmatpush3.msra.mxu0 %v2456_v26  ;;  %1418 = vmatpush3.msra.mxu1 %v2541_v43 }
  0x4f   :  { %1820 = vmatprep.subr.mxu0 %v2299_v0  ;;  %1419 = vmatprep.subr.mxu1 %v2544_v44 }
  0x50   :  { %1821 = vmatpush3.msra.mxu0 %v2460_v27  ;;  %1420 = vmatpush3.msra.mxu1 %v2547_v45 }
  0x51   :  { %1822 = vmatprep.subr.mxu0 %v2299_v0  ;;  %1421 = vmatprep.subr.mxu1 %v2550_v46 }
  0x52   :  { %1823 = vmatpush3.msra.mxu0 %v2464_v28  ;;  %1422 = vmatpush3.msra.mxu1 %v2553_v47 }
  0x53   :  { %1825 = vmatmul.mubr.f32.vlgmr.msra.gmra.mxu0 %v86_v29  ;;  %1827 = vmatprep.subr.mxu0 %v2299_v0  ;;  %v2641_v29 = vld [vmem:[%s3024_s5] ss:$0 sm:$0xff] }
  0x54   :  { %1828 = vmatpush3.msra.mxu0 %v2370_v1  ;;  %1859 = vmatprep.mubr.msk.f32.mxu0 %vm2300_vm0, %v2299_v0 }
  0x55   :  { %1829 = vmatprep.subr.mxu0 %v2299_v0  ;;  %1423 = vmatprep.subr.mxu1 %v2556_v48 }
  0x56   :  { %1830 = vmatpush3.msra.mxu0 %v2372_v2  ;;  %1424 = vmatpush3.msra.mxu1 %v2559_v49 }
  0x57   :  { %1831 = vmatprep.subr.mxu0 %v2299_v0  ;;  %1445 = vmatprep.subr.mxu1 %v2385_v6 }
  0x58   :  { %1832 = vmatpush3.msra.mxu0 %v2376_v3 }
  0x59   :  { %1833 = vmatprep.subr.mxu0 %v2299_v0 }
  0x5a   :  { %1834 = vmatpush3.msra.mxu0 %v2380_v4 }
  0x5b   :  { %1835 = vmatprep.subr.mxu0 %v2299_v0 }
  0x5c   :  { %1836 = vmatpush3.msra.mxu0 %v2383_v5 }
  0x5d   :  { %1837 = vmatprep.subr.mxu0 %v2299_v0 }
  0x5e   :  { %1838 = vmatpush3.msra.mxu0 %v2400_v11 }
  0x5f   :  { %1839 = vmatprep.subr.mxu0 %v2299_v0 }
  0x60   :  { %1840 = vmatpush3.msra.mxu0 %v2410_v14 }
  0x61   :  { %1841 = vmatprep.subr.mxu0 %v2299_v0 }
  0x62   :  { %1842 = vmatpush3.msra.mxu0 %v2420_v17 }
  0x63   :  { %1843 = vmatprep.subr.mxu0 %v2299_v0 }
  0x64   :  { %1844 = vmatpush3.msra.mxu0 %v2430_v20 }
  0x65   :  { %1845 = vmatprep.subr.mxu0 %v2299_v0 }
  0x66   :  { %1846 = vmatpush3.msra.mxu0 %v2438_v22 }
  0x67   :  { %1847 = vmatprep.subr.mxu0 %v2299_v0 }
  0x68   :  { %1848 = vmatpush3.msra.mxu0 %v2444_v23 }
  0x69   :  { %1849 = vmatprep.subr.mxu0 %v2299_v0 }
  0x6a   :  { %1850 = vmatpush3.msra.mxu0 %v2448_v24 }
  0x6b   :  { %1851 = vmatprep.subr.mxu0 %v2299_v0 }
  0x6c   :  { %1852 = vmatpush3.msra.mxu0 %v2452_v25 }
  0x6d   :  { %1853 = vmatprep.subr.mxu0 %v2299_v0 }
  0x6e   :  { %1854 = vmatpush3.msra.mxu0 %v2456_v26 }
  0x6f   :  { %1855 = vmatprep.subr.mxu0 %v2299_v0 }
  0x70   :  { %1856 = vmatpush3.msra.mxu0 %v2460_v27 }
  0x71   :  { %1857 = vmatprep.subr.mxu0 %v2299_v0 }
  0x72   :  { %1858 = vmatpush3.msra.mxu0 %v2464_v28 }
  0x73   :  { %1862 = vmatprep.subr.mxu0 %v2299_v0 }
 0x113   :  { %v210_v52 = vpop.f32.mrf.mxu0 }
 0x114   :  { %v214_v53 = vadd.f32 %v210_v52, %v143_v50 }
 0x115   :  { %v1826_v54 = vpop.f32.mrf.mxu0 }
 0x116   :  { %v221_v55 = vadd.f32 %v2568_v51, %v214_v53 }
 0x118   :  { %2082 = vtanh.f32 %v221_v55 }
 0x125   :  { %v2083_v57 = vpop.eup %2082 }
 0x126   :  { %293 = vmatprep.mubr.f32.mxu1 %v2083_v57  ;;  %1860 = vmatmul.mubr.f32.vlgmr.msra.gmra.mxu0 %v2083_v57 }
 0x127   :  { %294 = vmatmul.mubr.f32.vlgmr.msra.gmra.mxu1 %v87_v56  ;;  %1863 = vmatpush3.msra.mxu0 %v2370_v1  ;;  %v450_v56 = vld [vmem:[#allocation2 + $0x10] sm:$0xff] }
 0x128   :  { %1864 = vmatprep.subr.mxu0 %v2299_v0  ;;  %1446 = vmatpush3.msra.mxu1 %v2389_v7 }
 0x129   :  { %1865 = vmatpush3.msra.mxu0 %v2372_v2  ;;  %1447 = vmatprep.subr.mxu1 %v2391_v8 }
 0x12a   :  { %1866 = vmatprep.subr.mxu0 %v2299_v0  ;;  %1448 = vmatpush3.msra.mxu1 %v2393_v9 }
 0x12b   :  { %1867 = vmatpush3.msra.mxu0 %v2376_v3  ;;  %1449 = vmatprep.subr.mxu1 %v2397_v10 }
 0x12c   :  { %1868 = vmatprep.subr.mxu0 %v2299_v0  ;;  %1450 = vmatpush3.msra.mxu1 %v2403_v12 }
 0x12d   :  { %1869 = vmatpush3.msra.mxu0 %v2380_v4  ;;  %1451 = vmatprep.subr.mxu1 %v2407_v13 }
 0x12e   :  { %1870 = vmatprep.subr.mxu0 %v2299_v0  ;;  %1452 = vmatpush3.msra.mxu1 %v2413_v15 }
 0x12f   :  { %1871 = vmatpush3.msra.mxu0 %v2383_v5  ;;  %1453 = vmatprep.subr.mxu1 %v2417_v16 }
 0x130   :  { %1872 = vmatprep.subr.mxu0 %v2299_v0  ;;  %1454 = vmatpush3.msra.mxu1 %v2423_v18 }
 0x131   :  { %1873 = vmatpush3.msra.mxu0 %v2400_v11  ;;  %1455 = vmatprep.subr.mxu1 %v2427_v19 }
 0x132   :  { %1874 = vmatprep.subr.mxu0 %v2299_v0  ;;  %1456 = vmatpush3.msra.mxu1 %v2433_v21 }
 0x133   :  { %1875 = vmatpush3.msra.mxu0 %v2410_v14  ;;  %1457 = vmatprep.subr.mxu1 %v2504_v30 }
 0x134   :  { %1876 = vmatprep.subr.mxu0 %v2299_v0  ;;  %1458 = vmatpush3.msra.mxu1 %v2507_v31 }
 0x135   :  { %1877 = vmatpush3.msra.mxu0 %v2420_v17  ;;  %1459 = vmatprep.subr.mxu1 %v2510_v32 }
 0x136   :  { %1878 = vmatprep.subr.mxu0 %v2299_v0  ;;  %1460 = vmatpush3.msra.mxu1 %v2513_v33 }
 0x137   :  { %1879 = vmatpush3.msra.mxu0 %v2430_v20  ;;  %1461 = vmatprep.subr.mxu1 %v2516_v34 }
 0x138   :  { %1880 = vmatprep.subr.mxu0 %v2299_v0  ;;  %1462 = vmatpush3.msra.mxu1 %v2519_v35 }
 0x139   :  { %1881 = vmatpush3.msra.mxu0 %v2438_v22  ;;  %1463 = vmatprep.subr.mxu1 %v2522_v36 }
 0x13a   :  { %1882 = vmatprep.subr.mxu0 %v2299_v0  ;;  %1464 = vmatpush3.msra.mxu1 %v2524_v37 }
 0x13b   :  { %1883 = vmatpush3.msra.mxu0 %v2444_v23  ;;  %1465 = vmatprep.subr.mxu1 %v2526_v38 }
 0x13c   :  { %1884 = vmatprep.subr.mxu0 %v2299_v0  ;;  %1466 = vmatpush3.msra.mxu1 %v2529_v39 }
 0x13d   :  { %1885 = vmatpush3.msra.mxu0 %v2448_v24  ;;  %1467 = vmatprep.subr.mxu1 %v2532_v40 }
 0x13e   :  { %1886 = vmatprep.subr.mxu0 %v2299_v0  ;;  %1468 = vmatpush3.msra.mxu1 %v2535_v41 }
 0x13f   :  { %1887 = vmatpush3.msra.mxu0 %v2452_v25  ;;  %1469 = vmatprep.subr.mxu1 %v2538_v42 }
 0x140   :  { %1888 = vmatprep.subr.mxu0 %v2299_v0  ;;  %1470 = vmatpush3.msra.mxu1 %v2541_v43 }
 0x141   :  { %1889 = vmatpush3.msra.mxu0 %v2456_v26  ;;  %1471 = vmatprep.subr.mxu1 %v2544_v44 }
 0x142   :  { %1890 = vmatprep.subr.mxu0 %v2299_v0  ;;  %1472 = vmatpush3.msra.mxu1 %v2547_v45 }
 0x143   :  { %1891 = vmatpush3.msra.mxu0 %v2460_v27  ;;  %1473 = vmatprep.subr.mxu1 %v2550_v46 }
 0x144   :  { %1892 = vmatprep.subr.mxu0 %v2299_v0  ;;  %1894 = vmatprep.mubr.msk.f32.mxu0 %vm2300_vm0, %v2299_v0 }
 0x145   :  { %1893 = vmatpush3.msra.mxu0 %v2464_v28  ;;  %1474 = vmatpush3.msra.mxu1 %v2553_v47 }
 0x146   :  { %1475 = vmatprep.subr.mxu1 %v2556_v48  ;;  %1897 = vmatprep.subr.mxu0 %v2299_v0 }
 0x147   :  { %1476 = vmatpush3.msra.mxu1 %v2559_v49 }
 0x148   :  { %1497 = vmatprep.subr.mxu1 %v2385_v6 }
 0x1e6   :  { %v369_v59 = vpop.f32.mrf.mxu0 }
 0x1e7   :  { %v373_v60 = vadd.f32 %v369_v59, %v302_v58  ;;  %v1425_v61 = vpop.f32.mrf.mxu1 }
 0x1e8   :  { %v1861_v62 = vpop.f32.mrf.mxu0 }
 0x1e9   :  { %v374_v63 = vadd.f32 %v2568_v51, %v373_v60  ;;  %v1426_v50 = vpop.f32.mrf.mxu1 }
 0x1ea   :  { %v1427_v52 = vadd.f32 %v1426_v50, %v1425_v61 }
 0x1eb   :  { %2084 = vtanh.f32 %v374_v63 }
 0x1ec   :  { %v296_v53 = vadd.f32 %v1427_v52, %v2641_v29 }
 0x1ee   :  { %2086 = vtanh.f32 %v296_v53 }
 0x1f8   :  { %v2085_v54 = vpop.eup %2084 }
 0x1f9   :  { %440 = vmatprep.mubr.f32.mxu1 %v2085_v54  ;;  %1895 = vmatmul.mubr.f32.vlgmr.msra.gmra.mxu0 %v2085_v54  ;;  %v598_v54 = vld [vmem:[#allocation2 + $0x18] sm:$0xff] }
 0x1fa   :  { %1898 = vmatpush3.msra.mxu0 %v2370_v1  ;;  %1929 = vmatprep.mubr.msk.f32.mxu0 %vm2300_vm0, %v2299_v0 }
 0x1fb   :  { %v2087_v55 = vpop.eup %2086  ;;  %1899 = vmatprep.subr.mxu0 %v2299_v0 }
 0x1fc   :  { %300 = vst [vmem:[#allocation10] sm:$0xff] %v2087_v55  ;;  %441 = vmatmul.mubr.f32.vlgmr.msra.gmra.mxu1 %v2087_v55  ;;  %1900 = vmatpush3.msra.mxu0 %v2372_v2 }
 0x1fd   :  { %1901 = vmatprep.subr.mxu0 %v2299_v0  ;;  %1498 = vmatpush3.msra.mxu1 %v2389_v7 }
 0x1fe   :  { %1902 = vmatpush3.msra.mxu0 %v2376_v3  ;;  %1499 = vmatprep.subr.mxu1 %v2391_v8 }
 0x1ff   :  { %1903 = vmatprep.subr.mxu0 %v2299_v0  ;;  %1500 = vmatpush3.msra.mxu1 %v2393_v9 }
 0x200   :  { %1904 = vmatpush3.msra.mxu0 %v2380_v4  ;;  %1501 = vmatprep.subr.mxu1 %v2397_v10 }
 0x201   :  { %1905 = vmatprep.subr.mxu0 %v2299_v0  ;;  %1502 = vmatpush3.msra.mxu1 %v2403_v12 }
 0x202   :  { %1906 = vmatpush3.msra.mxu0 %v2383_v5  ;;  %1503 = vmatprep.subr.mxu1 %v2407_v13 }
 0x203   :  { %1907 = vmatprep.subr.mxu0 %v2299_v0  ;;  %1504 = vmatpush3.msra.mxu1 %v2413_v15 }
 0x204   :  { %1908 = vmatpush3.msra.mxu0 %v2400_v11  ;;  %1505 = vmatprep.subr.mxu1 %v2417_v16 }
 0x205   :  { %1909 = vmatprep.subr.mxu0 %v2299_v0  ;;  %1506 = vmatpush3.msra.mxu1 %v2423_v18 }
 0x206   :  { %1910 = vmatpush3.msra.mxu0 %v2410_v14  ;;  %1507 = vmatprep.subr.mxu1 %v2427_v19 }
 0x207   :  { %1911 = vmatprep.subr.mxu0 %v2299_v0  ;;  %1508 = vmatpush3.msra.mxu1 %v2433_v21 }
 0x208   :  { %1912 = vmatpush3.msra.mxu0 %v2420_v17  ;;  %1509 = vmatprep.subr.mxu1 %v2504_v30 }
 0x209   :  { %1913 = vmatprep.subr.mxu0 %v2299_v0  ;;  %1510 = vmatpush3.msra.mxu1 %v2507_v31 }
 0x20a   :  { %1914 = vmatpush3.msra.mxu0 %v2430_v20  ;;  %1511 = vmatprep.subr.mxu1 %v2510_v32 }
 0x20b   :  { %1915 = vmatprep.subr.mxu0 %v2299_v0  ;;  %1512 = vmatpush3.msra.mxu1 %v2513_v33 }
 0x20c   :  { %1916 = vmatpush3.msra.mxu0 %v2438_v22  ;;  %1513 = vmatprep.subr.mxu1 %v2516_v34 }
 0x20d   :  { %1917 = vmatprep.subr.mxu0 %v2299_v0  ;;  %1514 = vmatpush3.msra.mxu1 %v2519_v35 }
 0x20e   :  { %1918 = vmatpush3.msra.mxu0 %v2444_v23  ;;  %1515 = vmatprep.subr.mxu1 %v2522_v36 }
 0x20f   :  { %1919 = vmatprep.subr.mxu0 %v2299_v0  ;;  %1516 = vmatpush3.msra.mxu1 %v2524_v37 }
 0x210   :  { %1920 = vmatpush3.msra.mxu0 %v2448_v24  ;;  %1517 = vmatprep.subr.mxu1 %v2526_v38 }
 0x211   :  { %1921 = vmatprep.subr.mxu0 %v2299_v0  ;;  %1518 = vmatpush3.msra.mxu1 %v2529_v39 }
 0x212   :  { %1922 = vmatpush3.msra.mxu0 %v2452_v25  ;;  %1519 = vmatprep.subr.mxu1 %v2532_v40 }
 0x213   :  { %1923 = vmatprep.subr.mxu0 %v2299_v0  ;;  %1520 = vmatpush3.msra.mxu1 %v2535_v41 }
 0x214   :  { %1924 = vmatpush3.msra.mxu0 %v2456_v26  ;;  %1521 = vmatprep.subr.mxu1 %v2538_v42 }
 0x215   :  { %1925 = vmatprep.subr.mxu0 %v2299_v0  ;;  %1522 = vmatpush3.msra.mxu1 %v2541_v43 }
 0x216   :  { %1926 = vmatpush3.msra.mxu0 %v2460_v27  ;;  %1523 = vmatprep.subr.mxu1 %v2544_v44 }
 0x217   :  { %1927 = vmatprep.subr.mxu0 %v2299_v0  ;;  %1524 = vmatpush3.msra.mxu1 %v2547_v45 }
 0x218   :  { %1928 = vmatpush3.msra.mxu0 %v2464_v28  ;;  %1525 = vmatprep.subr.mxu1 %v2550_v46 }
 0x219   :  { %1526 = vmatpush3.msra.mxu1 %v2553_v47  ;;  %1932 = vmatprep.subr.mxu0 %v2299_v0 }
 0x21a   :  { %1527 = vmatprep.subr.mxu1 %v2556_v48 }
 0x21b   :  { %1528 = vmatpush3.msra.mxu1 %v2559_v49 }
 0x21c   :  { %1549 = vmatprep.subr.mxu1 %v2385_v6 }
 0x2b9   :  { %v517_v57 = vpop.f32.mrf.mxu0 }
 0x2ba   :  { %v521_v58 = vadd.f32 %v517_v57, %v450_v56 }
 0x2bb   :  { %v1896_v59 = vpop.f32.mrf.mxu0 }
 0x2bc   :  { %v522_v60 = vadd.f32 %v2568_v51, %v521_v58  ;;  %v1477_v61 = vpop.f32.mrf.mxu1 }
 0x2be   :  { %2088 = vtanh.f32 %v522_v60  ;;  %v1478_v62 = vpop.f32.mrf.mxu1 }
 0x2bf   :  { %v1479_v63 = vadd.f32 %v1478_v62, %v1477_v61 }
 0x2c1   :  { %v443_v50 = vadd.f32 %v1479_v63, %v2641_v29 }
 0x2c3   :  { %2090 = vtanh.f32 %v443_v50 }
 0x2cb   :  { %v2089_v52 = vpop.eup %2088 }
 0x2cc   :  { %588 = vmatprep.mubr.f32.mxu1 %v2089_v52  ;;  %1930 = vmatmul.mubr.f32.vlgmr.msra.gmra.mxu0 %v2089_v52  ;;  %v746_v52 = vld [vmem:[#allocation2 + $0x20] sm:$0xff] }
 0x2cd   :  { %1933 = vmatpush3.msra.mxu0 %v2370_v1  ;;  %1964 = vmatprep.mubr.msk.f32.mxu0 %vm2300_vm0, %v2299_v0 }
 0x2ce   :  { %1934 = vmatprep.subr.mxu0 %v2299_v0 }
 0x2cf   :  { %1935 = vmatpush3.msra.mxu0 %v2372_v2 }
 0x2d0   :  { %v2091_v53 = vpop.eup %2090  ;;  %1936 = vmatprep.subr.mxu0 %v2299_v0 }
 0x2d1   :  { %448 = vst [vmem:[#allocation10 + $0x8] sm:$0xff] %v2091_v53  ;;  %589 = vmatmul.mubr.f32.vlgmr.msra.gmra.mxu1 %v2091_v53  ;;  %1937 = vmatpush3.msra.mxu0 %v2376_v3 }
 0x2d2   :  { %1938 = vmatprep.subr.mxu0 %v2299_v0  ;;  %1550 = vmatpush3.msra.mxu1 %v2389_v7 }
 0x2d3   :  { %1939 = vmatpush3.msra.mxu0 %v2380_v4  ;;  %1551 = vmatprep.subr.mxu1 %v2391_v8 }
 0x2d4   :  { %1940 = vmatprep.subr.mxu0 %v2299_v0  ;;  %1552 = vmatpush3.msra.mxu1 %v2393_v9 }
 0x2d5   :  { %1941 = vmatpush3.msra.mxu0 %v2383_v5  ;;  %1553 = vmatprep.subr.mxu1 %v2397_v10 }
 0x2d6   :  { %1942 = vmatprep.subr.mxu0 %v2299_v0  ;;  %1554 = vmatpush3.msra.mxu1 %v2403_v12 }
 0x2d7   :  { %1943 = vmatpush3.msra.mxu0 %v2400_v11  ;;  %1555 = vmatprep.subr.mxu1 %v2407_v13 }
 0x2d8   :  { %1944 = vmatprep.subr.mxu0 %v2299_v0  ;;  %1556 = vmatpush3.msra.mxu1 %v2413_v15 }
 0x2d9   :  { %1945 = vmatpush3.msra.mxu0 %v2410_v14  ;;  %1557 = vmatprep.subr.mxu1 %v2417_v16 }
 0x2da   :  { %1946 = vmatprep.subr.mxu0 %v2299_v0  ;;  %1558 = vmatpush3.msra.mxu1 %v2423_v18 }
 0x2db   :  { %1947 = vmatpush3.msra.mxu0 %v2420_v17  ;;  %1559 = vmatprep.subr.mxu1 %v2427_v19 }
 0x2dc   :  { %1948 = vmatprep.subr.mxu0 %v2299_v0  ;;  %1560 = vmatpush3.msra.mxu1 %v2433_v21 }
 0x2dd   :  { %1949 = vmatpush3.msra.mxu0 %v2430_v20  ;;  %1561 = vmatprep.subr.mxu1 %v2504_v30 }
 0x2de   :  { %1950 = vmatprep.subr.mxu0 %v2299_v0  ;;  %1562 = vmatpush3.msra.mxu1 %v2507_v31 }
 0x2df   :  { %1951 = vmatpush3.msra.mxu0 %v2438_v22  ;;  %1563 = vmatprep.subr.mxu1 %v2510_v32 }
 0x2e0   :  { %1952 = vmatprep.subr.mxu0 %v2299_v0  ;;  %1564 = vmatpush3.msra.mxu1 %v2513_v33 }
 0x2e1   :  { %1953 = vmatpush3.msra.mxu0 %v2444_v23  ;;  %1565 = vmatprep.subr.mxu1 %v2516_v34 }
 0x2e2   :  { %1954 = vmatprep.subr.mxu0 %v2299_v0  ;;  %1566 = vmatpush3.msra.mxu1 %v2519_v35 }
 0x2e3   :  { %1955 = vmatpush3.msra.mxu0 %v2448_v24  ;;  %1567 = vmatprep.subr.mxu1 %v2522_v36 }
 0x2e4   :  { %1956 = vmatprep.subr.mxu0 %v2299_v0  ;;  %1568 = vmatpush3.msra.mxu1 %v2524_v37 }
 0x2e5   :  { %1957 = vmatpush3.msra.mxu0 %v2452_v25  ;;  %1569 = vmatprep.subr.mxu1 %v2526_v38 }
 0x2e6   :  { %1958 = vmatprep.subr.mxu0 %v2299_v0  ;;  %1570 = vmatpush3.msra.mxu1 %v2529_v39 }
 0x2e7   :  { %1959 = vmatpush3.msra.mxu0 %v2456_v26  ;;  %1571 = vmatprep.subr.mxu1 %v2532_v40 }
 0x2e8   :  { %1960 = vmatprep.subr.mxu0 %v2299_v0  ;;  %1572 = vmatpush3.msra.mxu1 %v2535_v41 }
 0x2e9   :  { %1961 = vmatpush3.msra.mxu0 %v2460_v27  ;;  %1573 = vmatprep.subr.mxu1 %v2538_v42 }
 0x2ea   :  { %1962 = vmatprep.subr.mxu0 %v2299_v0  ;;  %1574 = vmatpush3.msra.mxu1 %v2541_v43 }
 0x2eb   :  { %1963 = vmatpush3.msra.mxu0 %v2464_v28  ;;  %1575 = vmatprep.subr.mxu1 %v2544_v44 }
 0x2ec   :  { %1576 = vmatpush3.msra.mxu1 %v2547_v45  ;;  %1967 = vmatprep.subr.mxu0 %v2299_v0 }
 0x2ed   :  { %1577 = vmatprep.subr.mxu1 %v2550_v46 }
 0x2ee   :  { %1578 = vmatpush3.msra.mxu1 %v2553_v47 }
 0x2ef   :  { %1579 = vmatprep.subr.mxu1 %v2556_v48 }
 0x2f0   :  { %1580 = vmatpush3.msra.mxu1 %v2559_v49 }
 0x2f1   :  { %1601 = vmatprep.subr.mxu1 %v2385_v6 }
 0x38c   :  { %v665_v55 = vpop.f32.mrf.mxu0 }
 0x38d   :  { %v669_v56 = vadd.f32 %v665_v55, %v598_v54 }
 0x38e   :  { %v1931_v57 = vpop.f32.mrf.mxu0 }
 0x38f   :  { %v670_v58 = vadd.f32 %v2568_v51, %v669_v56 }
 0x391   :  { %2092 = vtanh.f32 %v670_v58  ;;  %v1529_v59 = vpop.f32.mrf.mxu1 }
 0x393   :  { %v1530_v60 = vpop.f32.mrf.mxu1 }
 0x394   :  { %v1531_v61 = vadd.f32 %v1530_v60, %v1529_v59 }
 0x396   :  { %v591_v62 = vadd.f32 %v1531_v61, %v2641_v29 }
 0x398   :  { %2094 = vtanh.f32 %v591_v62  ;;  %v2947_v62 = vld [vmem:[#allocation8 + $0x60] sm:$0xff] }
 0x39e   :  { %v2093_v63 = vpop.eup %2092 }
 0x39f   :  { %736 = vmatprep.mubr.f32.mxu1 %v2093_v63  ;;  %1965 = vmatmul.mubr.f32.vlgmr.msra.gmra.mxu0 %v2093_v63  ;;  %v2131_v63 = vld [vmem:[#allocation7 + $0x30] sm:$0xff] }
 0x3a0   :  { %1968 = vmatpush3.msra.mxu0 %v2370_v1  ;;  %1999 = vmatprep.mubr.msk.f32.mxu0 %vm2300_vm0, %v2299_v0 }
 0x3a1   :  { %1969 = vmatprep.subr.mxu0 %v2299_v0 }
 0x3a2   :  { %1970 = vmatpush3.msra.mxu0 %v2372_v2 }
 0x3a3   :  { %1971 = vmatprep.subr.mxu0 %v2299_v0 }
 0x3a4   :  { %1972 = vmatpush3.msra.mxu0 %v2376_v3 }
 0x3a5   :  { %v2095_v50 = vpop.eup %2094  ;;  %1973 = vmatprep.subr.mxu0 %v2299_v0 }
 0x3a6   :  { %596 = vst [vmem:[#allocation10 + $0x10] sm:$0xff] %v2095_v50  ;;  %737 = vmatmul.mubr.f32.vlgmr.msra.gmra.mxu1 %v2095_v50  ;;  %1974 = vmatpush3.msra.mxu0 %v2380_v4  ;;  %v2950_v50 = vld [vmem:[#allocation8 + $0xd8] sm:$0xff] }
 0x3a7   :  { %1975 = vmatprep.subr.mxu0 %v2299_v0  ;;  %1602 = vmatpush3.msra.mxu1 %v2389_v7 }
 0x3a8   :  { %1976 = vmatpush3.msra.mxu0 %v2383_v5  ;;  %1603 = vmatprep.subr.mxu1 %v2391_v8 }
 0x3a9   :  { %1977 = vmatprep.subr.mxu0 %v2299_v0  ;;  %1604 = vmatpush3.msra.mxu1 %v2393_v9 }
 0x3aa   :  { %1978 = vmatpush3.msra.mxu0 %v2400_v11  ;;  %1605 = vmatprep.subr.mxu1 %v2397_v10 }
 0x3ab   :  { %1979 = vmatprep.subr.mxu0 %v2299_v0  ;;  %1606 = vmatpush3.msra.mxu1 %v2403_v12 }
 0x3ac   :  { %1980 = vmatpush3.msra.mxu0 %v2410_v14  ;;  %1607 = vmatprep.subr.mxu1 %v2407_v13 }
 0x3ad   :  { %1981 = vmatprep.subr.mxu0 %v2299_v0  ;;  %1608 = vmatpush3.msra.mxu1 %v2413_v15 }
 0x3ae   :  { %1982 = vmatpush3.msra.mxu0 %v2420_v17  ;;  %1609 = vmatprep.subr.mxu1 %v2417_v16 }
 0x3af   :  { %1983 = vmatprep.subr.mxu0 %v2299_v0  ;;  %1610 = vmatpush3.msra.mxu1 %v2423_v18 }
 0x3b0   :  { %1984 = vmatpush3.msra.mxu0 %v2430_v20  ;;  %1611 = vmatprep.subr.mxu1 %v2427_v19 }
 0x3b1   :  { %1985 = vmatprep.subr.mxu0 %v2299_v0  ;;  %1612 = vmatpush3.msra.mxu1 %v2433_v21 }
 0x3b2   :  { %1986 = vmatpush3.msra.mxu0 %v2438_v22  ;;  %1613 = vmatprep.subr.mxu1 %v2504_v30 }
 0x3b3   :  { %1987 = vmatprep.subr.mxu0 %v2299_v0  ;;  %1614 = vmatpush3.msra.mxu1 %v2507_v31 }
 0x3b4   :  { %1988 = vmatpush3.msra.mxu0 %v2444_v23  ;;  %1615 = vmatprep.subr.mxu1 %v2510_v32 }
 0x3b5   :  { %1989 = vmatprep.subr.mxu0 %v2299_v0  ;;  %1616 = vmatpush3.msra.mxu1 %v2513_v33 }
 0x3b6   :  { %1990 = vmatpush3.msra.mxu0 %v2448_v24  ;;  %1617 = vmatprep.subr.mxu1 %v2516_v34 }
 0x3b7   :  { %1991 = vmatprep.subr.mxu0 %v2299_v0  ;;  %1618 = vmatpush3.msra.mxu1 %v2519_v35 }
 0x3b8   :  { %1992 = vmatpush3.msra.mxu0 %v2452_v25  ;;  %1619 = vmatprep.subr.mxu1 %v2522_v36 }
 0x3b9   :  { %1993 = vmatprep.subr.mxu0 %v2299_v0  ;;  %1620 = vmatpush3.msra.mxu1 %v2524_v37 }
 0x3ba   :  { %1994 = vmatpush3.msra.mxu0 %v2456_v26  ;;  %1621 = vmatprep.subr.mxu1 %v2526_v38 }
 0x3bb   :  { %1995 = vmatprep.subr.mxu0 %v2299_v0  ;;  %1622 = vmatpush3.msra.mxu1 %v2529_v39 }
 0x3bc   :  { %1996 = vmatpush3.msra.mxu0 %v2460_v27  ;;  %1623 = vmatprep.subr.mxu1 %v2532_v40 }
 0x3bd   :  { %1997 = vmatprep.subr.mxu0 %v2299_v0  ;;  %1624 = vmatpush3.msra.mxu1 %v2535_v41 }
 0x3be   :  { %1998 = vmatpush3.msra.mxu0 %v2464_v28  ;;  %1625 = vmatprep.subr.mxu1 %v2538_v42 }
 0x3bf   :  { %1626 = vmatpush3.msra.mxu1 %v2541_v43  ;;  %2002 = vmatprep.subr.mxu0 %v2299_v0 }
 0x3c0   :  { %1627 = vmatprep.subr.mxu1 %v2544_v44 }
 0x3c1   :  { %1628 = vmatpush3.msra.mxu1 %v2547_v45 }
 0x3c2   :  { %1629 = vmatprep.subr.mxu1 %v2550_v46 }
 0x3c3   :  { %1630 = vmatpush3.msra.mxu1 %v2553_v47 }
 0x3c4   :  { %1631 = vmatprep.subr.mxu1 %v2556_v48 }
 0x3c5   :  { %1632 = vmatpush3.msra.mxu1 %v2559_v49 }
 0x3c6   :  { %1653 = vmatprep.subr.mxu1 %v2385_v6 }
 0x45f   :  { %v813_v53 = vpop.f32.mrf.mxu0 }
 0x460   :  { %v817_v54 = vadd.f32 %v813_v53, %v746_v52  ;;  %v2954_v52 = vld [vmem:[#allocation8 + $0x58] sm:$0xff]  ;;  %v2134_v53 = vld [vmem:[#allocation7 + $0x28] sm:$0xff] }
 0x461   :  { %v1966_v55 = vpop.f32.mrf.mxu0 }
 0x462   :  { %v818_v56 = vadd.f32 %v2568_v51, %v817_v54  ;;  %v2957_v54 = vld [vmem:[#allocation8 + $0xd0] sm:$0xff] }
 0x463   :  { %v2961_v55 = vld [vmem:[#allocation8 + $0x50] sm:$0xff] }
 0x464   :  { %2096 = vtanh.f32 %v818_v56  ;;  %v2137_v56 = vld [vmem:[#allocation7 + $0x20] sm:$0xff] }
 0x466   :  { %v1581_v57 = vpop.f32.mrf.mxu1 }
 0x468   :  { %v1582_v58 = vpop.f32.mrf.mxu1 }
 0x469   :  { %v1583_v59 = vadd.f32 %v1582_v58, %v1581_v57  ;;  %v2138_v57 = vld [vmem:[#allocation7 + $0x18] sm:$0xff]  ;;  %v2139_v58 = vld [vmem:[#allocation7 + $0x10] sm:$0xff] }
 0x46b   :  { %v739_v60 = vadd.f32 %v1583_v59, %v2641_v29  ;;  %v2151_v59 = vld [vmem:[#allocation8 + $0x28] sm:$0xff] }
 0x46d   :  { %2098 = vtanh.f32 %v739_v60  ;;  %v2152_v60 = vld [vmem:[#allocation8 + $0xa0] sm:$0xff] }
 0x471   :  { %v2097_v61 = vpop.eup %2096 }
 0x472   :  { %884 = vmatprep.mubr.f32.mxu1 %v2097_v61  ;;  %2000 = vmatmul.mubr.f32.vlgmr.msra.gmra.mxu0 %v2097_v61  ;;  %v2153_v61 = vld [vmem:[#allocation8 + $0x20] sm:$0xff] }
 0x473   :  { %2003 = vmatpush3.msra.mxu0 %v2370_v1  ;;  %2034 = vmatprep.mubr.msk.f32.mxu0 %vm2300_vm0, %v2299_v0  ;;  %v2913_v1 = vld [vmem:[#allocation8 + $0xf8] sm:$0xff] }
 0x474   :  { %2004 = vmatprep.subr.mxu0 %v2299_v0 }
 0x475   :  { %2005 = vmatpush3.msra.mxu0 %v2372_v2  ;;  %v894_v2 = vld [vmem:[#allocation2 + $0x28] sm:$0xff] }
 0x476   :  { %2006 = vmatprep.subr.mxu0 %v2299_v0 }
 0x477   :  { %2007 = vmatpush3.msra.mxu0 %v2376_v3 }
 0x478   :  { %2008 = vmatprep.subr.mxu0 %v2299_v0 }
 0x479   :  { %2009 = vmatpush3.msra.mxu0 %v2380_v4 }
 0x47a   :  { %v2099_v6 = vpop.eup %2098  ;;  %2010 = vmatprep.subr.mxu0 %v2299_v0 }
 0x47b   :  { %744 = vst [vmem:[#allocation10 + $0x18] sm:$0xff] %v2099_v6  ;;  %885 = vmatmul.mubr.f32.vlgmr.msra.gmra.mxu1 %v2099_v6  ;;  %2011 = vmatpush3.msra.mxu0 %v2383_v5  ;;  %v2154_v6 = vld [vmem:[#allocation8 + $0x98] sm:$0xff] }
 0x47c   :  { %2012 = vmatprep.subr.mxu0 %v2299_v0  ;;  %1654 = vmatpush3.msra.mxu1 %v2389_v7 }
 0x47d   :  { %2013 = vmatpush3.msra.mxu0 %v2400_v11  ;;  %1655 = vmatprep.subr.mxu1 %v2391_v8 }
 0x47e   :  { %2014 = vmatprep.subr.mxu0 %v2299_v0  ;;  %1656 = vmatpush3.msra.mxu1 %v2393_v9 }
 0x47f   :  { %2015 = vmatpush3.msra.mxu0 %v2410_v14  ;;  %1657 = vmatprep.subr.mxu1 %v2397_v10  ;;  %v2116_v14 = vld [vmem:[#allocation7 + $0x70] sm:$0xff] }
 0x480   :  { %2016 = vmatprep.subr.mxu0 %v2299_v0  ;;  %1658 = vmatpush3.msra.mxu1 %v2403_v12 }
 0x481   :  { %2017 = vmatpush3.msra.mxu0 %v2420_v17  ;;  %1659 = vmatprep.subr.mxu1 %v2407_v13  ;;  %v2115_v13 = vld [vmem:[#allocation7 + $0x78] sm:$0xff] }
 0x482   :  { %2018 = vmatprep.subr.mxu0 %v2299_v0  ;;  %1660 = vmatpush3.msra.mxu1 %v2413_v15  ;;  %v2117_v15 = vld [vmem:[#allocation7 + $0x68] sm:$0xff]  ;;  %v2119_v17 = vld [vmem:[#allocation7 + $0x58] sm:$0xff] }
 0x483   :  { %2019 = vmatpush3.msra.mxu0 %v2430_v20  ;;  %1661 = vmatprep.subr.mxu1 %v2417_v16  ;;  %v2118_v16 = vld [vmem:[#allocation7 + $0x60] sm:$0xff]  ;;  %v2926_v20 = vld [vmem:[#allocation8 + $0x78] sm:$0xff] }
 0x484   :  { %2020 = vmatprep.subr.mxu0 %v2299_v0  ;;  %1662 = vmatpush3.msra.mxu1 %v2423_v18 }
 0x485   :  { %2021 = vmatpush3.msra.mxu0 %v2438_v22  ;;  %1663 = vmatprep.subr.mxu1 %v2427_v19  ;;  %v2120_v19 = vld [vmem:[#allocation7 + $0x50] sm:$0xff] }
 0x486   :  { %2022 = vmatprep.subr.mxu0 %v2299_v0  ;;  %1664 = vmatpush3.msra.mxu1 %v2433_v21  ;;  %v2122_v21 = vld [vmem:[#allocation7 + $0x48] sm:$0xff]  ;;  %v2929_v22 = vld [vmem:[#allocation8 + $0xf0] sm:$0xff] }
 0x487   :  { %2023 = vmatpush3.msra.mxu0 %v2444_v23  ;;  %1665 = vmatprep.subr.mxu1 %v2504_v30  ;;  %v2933_v23 = vld [vmem:[#allocation8 + $0x70] sm:$0xff] }
 0x488   :  { %2024 = vmatprep.subr.mxu0 %v2299_v0  ;;  %1666 = vmatpush3.msra.mxu1 %v2507_v31 }
 0x489   :  { %2025 = vmatpush3.msra.mxu0 %v2448_v24  ;;  %1667 = vmatprep.subr.mxu1 %v2510_v32  ;;  %v2125_v24 = vld [vmem:[#allocation7 + $0x40] sm:$0xff] }
 0x48a   :  { %2026 = vmatprep.subr.mxu0 %v2299_v0  ;;  %1668 = vmatpush3.msra.mxu1 %v2513_v33 }
 0x48b   :  { %2027 = vmatpush3.msra.mxu0 %v2452_v25  ;;  %1669 = vmatprep.subr.mxu1 %v2516_v34  ;;  %v2936_v25 = vld [vmem:[#allocation8 + $0xe8] sm:$0xff] }
 0x48c   :  { %2028 = vmatprep.subr.mxu0 %v2299_v0  ;;  %1670 = vmatpush3.msra.mxu1 %v2519_v35 }
 0x48d   :  { %2029 = vmatpush3.msra.mxu0 %v2456_v26  ;;  %1671 = vmatprep.subr.mxu1 %v2522_v36  ;;  %v2940_v26 = vld [vmem:[#allocation8 + $0x68] sm:$0xff] }
 0x48e   :  { %2030 = vmatprep.subr.mxu0 %v2299_v0  ;;  %1672 = vmatpush3.msra.mxu1 %v2524_v37 }
 0x48f   :  { %2031 = vmatpush3.msra.mxu0 %v2460_v27  ;;  %1673 = vmatprep.subr.mxu1 %v2526_v38  ;;  %v2128_v27 = vld [vmem:[#allocation7 + $0x38] sm:$0xff] }
 0x490   :  { %2032 = vmatprep.subr.mxu0 %v2299_v0  ;;  %1674 = vmatpush3.msra.mxu1 %v2529_v39 }
 0x491   :  { %2033 = vmatpush3.msra.mxu0 %v2464_v28  ;;  %1675 = vmatprep.subr.mxu1 %v2532_v40  ;;  %v2943_v28 = vld [vmem:[#allocation8 + $0xe0] sm:$0xff] }
 0x492   :  { %1676 = vmatpush3.msra.mxu1 %v2535_v41  ;;  %2037 = vmatprep.subr.mxu0 %v2299_v0 }
 0x493   :  { %1677 = vmatprep.subr.mxu1 %v2538_v42 }
 0x494   :  { %1678 = vmatpush3.msra.mxu1 %v2541_v43 }
 0x495   :  { %1679 = vmatprep.subr.mxu1 %v2544_v44 }
 0x496   :  { %1680 = vmatpush3.msra.mxu1 %v2547_v45 }
 0x497   :  { %1681 = vmatprep.subr.mxu1 %v2550_v46 }
 0x498   :  { %1682 = vmatpush3.msra.mxu1 %v2553_v47 }
 0x499   :  { %1683 = vmatprep.subr.mxu1 %v2556_v48 }
 0x49a   :  { %1684 = vmatpush3.msra.mxu1 %v2559_v49 }
 0x49b   :  { %1705 = vmatprep.subr.mxu1 %v2913_v1 }
 0x532   :  { %v961_v3 = vpop.f32.mrf.mxu0 }
 0x533   :  { %v965_v4 = vadd.f32 %v961_v3, %v894_v2  ;;  %v2156_v2 = vld [vmem:[#allocation8 + $0x90] sm:$0xff] }
 0x534   :  { %v2001_v5 = vpop.f32.mrf.mxu0  ;;  %v2157_v3 = vld [vmem:[#allocation8 + $0x10] sm:$0xff] }
 0x535   :  { %v966_v7 = vadd.f32 %v2568_v51, %v965_v4  ;;  %v2158_v4 = vld [vmem:[#allocation8 + $0x88] sm:$0xff] }
 0x536   :  { %v2159_v5 = vld [vmem:[#allocation8 + $0x8] sm:$0xff] }
 0x537   :  { %2100 = vtanh.f32 %v966_v7  ;;  %v2160_v7 = vld [vmem:[#allocation8 + $0x80] sm:$0xff] }
 0x53b   :  { %v1633_v8 = vpop.f32.mrf.mxu1 }
 0x53d   :  { %v1634_v9 = vpop.f32.mrf.mxu1 }
 0x53e   :  { %v1635_v10 = vadd.f32 %v1634_v9, %v1633_v8  ;;  %v2161_v8 = vld [vmem:[#allocation8] sm:$0xff]  ;;  %v1190_v9 = vld [vmem:[#allocation2 + $0x38] sm:$0xff] }
 0x540   :  { %v887_v11 = vadd.f32 %v1635_v10, %v2641_v29 }
 0x542   :  { %2102 = vtanh.f32 %v887_v11 }
 0x544   :  { %v2101_v12 = vpop.eup %2100 }
 0x545   :  { %1032 = vmatprep.mubr.f32.mxu1 %v2101_v12  ;;  %2035 = vmatmul.mubr.f32.vlgmr.msra.gmra.mxu0 %v2101_v12 }
 0x546   :  { %2038 = vmatpush3.msra.mxu0 %v2115_v13  ;;  %2069 = vmatprep.mubr.msk.f32.mxu0 %vm2300_vm0, %v2299_v0  ;;  %v2162_v13 = vld [vmem:[%s3022_s3] ss:$0 sm:$0xff]  ;;  %s2301_s3 = smov [#allocation10]  }
 0x547   :  { %2039 = vmatprep.subr.mxu0 %v2299_v0  ;;  %s1344_s24 = sshll.u32 %s2301_s3, 4  ;;  %s1345_s24 = int_to_ptr.vmem [resolvable:$true] %s1344_s24 }
 0x548   :  { %2040 = vmatpush3.msra.mxu0 %v2116_v14  ;;  %s2243_s27 = scalar_lea.vmem %s1345_s24, 1024  ;;  %p2248_p7 = scmp.lt.s32.totalorder %s1345_s24, %s1345_s24 }
 0x549   :  { %2041 = vmatprep.subr.mxu0 %v2299_v0  ;;  %p2244_p6 = scmp.ne.s32.totalorder %s1345_s24, %s2243_s27  ;;  %p2249_p8 = scmp.lt.s32.totalorder %s2243_s27, %s2243_s27 }
 0x54a   :  { %2042 = vmatpush3.msra.mxu0 %v2117_v15 }
 0x54b   :  { %2043 = vmatprep.subr.mxu0 %v2299_v0  ;;  %p2250_p9 = por %p2249_p8, %p2248_p7 }
 0x54c   :  { %2044 = vmatpush3.msra.mxu0 %v2118_v16 }
 0x54d   :  { %2045 = vmatprep.subr.mxu0 %v2299_v0  ;;  %p2251_p10 = pnand %p2250_p9, %p2244_p6 }
 0x54e   :  { %2046 = vmatpush3.msra.mxu0 %v2119_v17 }
 0x54f   :  { %v2103_v18 = vpop.eup %2102  ;;  %2047 = vmatprep.subr.mxu0 %v2299_v0 }
 0x550   :  { %892 = vst [vmem:[#allocation10 + $0x20] sm:$0xff] %v2103_v18  ;;  %1033 = vmatmul.mubr.f32.vlgmr.msra.gmra.mxu1 %v2103_v18  ;;  %2048 = vmatpush3.msra.mxu0 %v2120_v19 }
 0x551   :  { %2049 = vmatprep.subr.mxu0 %v2299_v0  ;;  %1706 = vmatpush3.msra.mxu1 %v2926_v20 }
 0x552   :  { %2050 = vmatpush3.msra.mxu0 %v2122_v21  ;;  %1707 = vmatprep.subr.mxu1 %v2929_v22 }
 0x553   :  { %2051 = vmatprep.subr.mxu0 %v2299_v0  ;;  %1708 = vmatpush3.msra.mxu1 %v2933_v23 }
 0x554   :  { %2052 = vmatpush3.msra.mxu0 %v2125_v24  ;;  %1709 = vmatprep.subr.mxu1 %v2936_v25 }
 0x555   :  { %2053 = vmatprep.subr.mxu0 %v2299_v0  ;;  %1710 = vmatpush3.msra.mxu1 %v2940_v26 }
 0x556   :  { %2054 = vmatpush3.msra.mxu0 %v2128_v27  ;;  %1711 = vmatprep.subr.mxu1 %v2943_v28 }
 0x557   :  { %2055 = vmatprep.subr.mxu0 %v2299_v0  ;;  %1712 = vmatpush3.msra.mxu1 %v2947_v62 }
 0x558   :  { %2056 = vmatpush3.msra.mxu0 %v2131_v63  ;;  %1713 = vmatprep.subr.mxu1 %v2950_v50 }
 0x559   :  { %2057 = vmatprep.subr.mxu0 %v2299_v0  ;;  %1714 = vmatpush3.msra.mxu1 %v2954_v52 }
 0x55a   :  { %2058 = vmatpush3.msra.mxu0 %v2134_v53  ;;  %1715 = vmatprep.subr.mxu1 %v2957_v54 }
 0x55b   :  { %2059 = vmatprep.subr.mxu0 %v2299_v0  ;;  %1716 = vmatpush3.msra.mxu1 %v2961_v55 }
 0x55c   :  { %2060 = vmatpush3.msra.mxu0 %v2137_v56  ;;  %1717 = vmatprep.subr.mxu1 %v2504_v30  ;;  %v2140_v30 = vld [vmem:[#allocation7 + $0x8] sm:$0xff] }
 0x55d   :  { %2061 = vmatprep.subr.mxu0 %v2299_v0  ;;  %1718 = vmatpush3.msra.mxu1 %v2507_v31  ;;  %v2141_v31 = vld [vmem:[#allocation7] sm:$0xff] }
 0x55e   :  { %2062 = vmatpush3.msra.mxu0 %v2138_v57  ;;  %1719 = vmatprep.subr.mxu1 %v2510_v32 }
 0x55f   :  { %2063 = vmatprep.subr.mxu0 %v2299_v0  ;;  %1720 = vmatpush3.msra.mxu1 %v2513_v33 }
 0x560   :  { %2064 = vmatpush3.msra.mxu0 %v2139_v58  ;;  %1721 = vmatprep.subr.mxu1 %v2516_v34 }
 0x561   :  { %2065 = vmatprep.subr.mxu0 %v2299_v0  ;;  %1722 = vmatpush3.msra.mxu1 %v2519_v35 }
 0x562   :  { %2066 = vmatpush3.msra.mxu0 %v2140_v30  ;;  %1723 = vmatprep.subr.mxu1 %v2522_v36 }
 0x563   :  { %2067 = vmatprep.subr.mxu0 %v2299_v0  ;;  %1724 = vmatpush3.msra.mxu1 %v2524_v37  ;;  %v1042_v0 = vld [vmem:[#allocation2 + $0x30] sm:$0xff] }
 0x564   :  { %2068 = vmatpush3.msra.mxu0 %v2141_v31  ;;  %1725 = vmatprep.subr.mxu1 %v2526_v38 }
 0x565   :  { %1726 = vmatpush3.msra.mxu1 %v2529_v39 }
 0x566   :  { %1727 = vmatprep.subr.mxu1 %v2532_v40 }
 0x567   :  { %1728 = vmatpush3.msra.mxu1 %v2535_v41 }
 0x568   :  { %1729 = vmatprep.subr.mxu1 %v2538_v42  ;;  %v2142_v42 = vld [vmem:[#allocation8 + $0xc8] sm:$0xff] }
 0x569   :  { %1730 = vmatpush3.msra.mxu1 %v2541_v43  ;;  %v2143_v43 = vld [vmem:[#allocation8 + $0x48] sm:$0xff] }
 0x56a   :  { %1731 = vmatprep.subr.mxu1 %v2544_v44  ;;  %v2144_v44 = vld [vmem:[#allocation8 + $0xc0] sm:$0xff] }
 0x56b   :  { %1732 = vmatpush3.msra.mxu1 %v2547_v45  ;;  %v2145_v45 = vld [vmem:[#allocation8 + $0x40] sm:$0xff] }
 0x56c   :  { %1733 = vmatprep.subr.mxu1 %v2550_v46  ;;  %v2146_v46 = vld [vmem:[#allocation8 + $0xb8] sm:$0xff] }
 0x56d   :  { %1734 = vmatpush3.msra.mxu1 %v2553_v47  ;;  %v2147_v47 = vld [vmem:[#allocation8 + $0x38] sm:$0xff] }
 0x56e   :  { %1735 = vmatprep.subr.mxu1 %v2556_v48  ;;  %v2148_v48 = vld [vmem:[#allocation8 + $0xb0] sm:$0xff] }
 0x56f   :  { %1736 = vmatpush3.msra.mxu1 %v2559_v49  ;;  %v2149_v49 = vld [vmem:[#allocation8 + $0x30] sm:$0xff] }
 0x570   :  { %1757 = vmatprep.subr.mxu1 %v2913_v1  ;;  %v2155_v1 = vld [vmem:[#allocation8 + $0x18] sm:$0xff] }
 0x605   :  { %v1109_v32 = vpop.f32.mrf.mxu0 }
 0x606   :  { %v1113_v33 = vadd.f32 %v1109_v32, %v1042_v0 }
 0x607   :  { %v2036_v34 = vpop.f32.mrf.mxu0 }
 0x608   :  { %v1114_v35 = vadd.f32 %v2568_v51, %v1113_v33  ;;  %v2150_v51 = vld [vmem:[#allocation8 + $0xa8] sm:$0xff] }
 0x60a   :  { %2104 = vtanh.f32 %v1114_v35 }
 0x610   :  { %v1685_v36 = vpop.f32.mrf.mxu1 }
 0x612   :  { %v1686_v37 = vpop.f32.mrf.mxu1 }
 0x613   :  { %v1687_v38 = vadd.f32 %v1686_v37, %v1685_v36 }
 0x615   :  { %v1035_v39 = vadd.f32 %v1687_v38, %v2641_v29 }
 0x617   :  { %v2105_v40 = vpop.eup %2104  ;;  %2106 = vtanh.f32 %v1035_v39 }
 0x618   :  { %1180 = vmatprep.mubr.f32.mxu1 %v2105_v40  ;;  %2070 = vmatmul.mubr.f32.vlgmr.msra.gmra.mxu0 %v2105_v40 }
 0x624   :  { %v2107_v41 = vpop.eup %2106 }
 0x625   :  { %1040 = vst [vmem:[#allocation10 + $0x28] sm:$0xff] %v2107_v41  ;;  %1181 = vmatmul.mubr.f32.vlgmr.msra.gmra.mxu1 %v2107_v41 }
 0x626   :  { %1758 = vmatpush3.msra.mxu1 %v2926_v20 }
 0x627   :  { %1759 = vmatprep.subr.mxu1 %v2929_v22 }
 0x628   :  { %1760 = vmatpush3.msra.mxu1 %v2933_v23 }
 0x629   :  { %1761 = vmatprep.subr.mxu1 %v2936_v25 }
 0x62a   :  { %1762 = vmatpush3.msra.mxu1 %v2940_v26 }
 0x62b   :  { %1763 = vmatprep.subr.mxu1 %v2943_v28 }
 0x62c   :  { %1764 = vmatpush3.msra.mxu1 %v2947_v62 }
 0x62d   :  { %1765 = vmatprep.subr.mxu1 %v2950_v50 }
 0x62e   :  { %1766 = vmatpush3.msra.mxu1 %v2954_v52 }
 0x62f   :  { %1767 = vmatprep.subr.mxu1 %v2957_v54 }
 0x630   :  { %1768 = vmatpush3.msra.mxu1 %v2961_v55 }
 0x631   :  { %1769 = vmatprep.subr.mxu1 %v2142_v42 }
 0x632   :  { %1770 = vmatpush3.msra.mxu1 %v2143_v43 }
 0x633   :  { %1771 = vmatprep.subr.mxu1 %v2144_v44 }
 0x634   :  { %1772 = vmatpush3.msra.mxu1 %v2145_v45 }
 0x635   :  { %1773 = vmatprep.subr.mxu1 %v2146_v46 }
 0x636   :  { %1774 = vmatpush3.msra.mxu1 %v2147_v47 }
 0x637   :  { %1775 = vmatprep.subr.mxu1 %v2148_v48 }
 0x638   :  { %1776 = vmatpush3.msra.mxu1 %v2149_v49 }
 0x639   :  { %1777 = vmatprep.subr.mxu1 %v2150_v51 }
 0x63a   :  { %1778 = vmatpush3.msra.mxu1 %v2151_v59 }
 0x63b   :  { %1779 = vmatprep.subr.mxu1 %v2152_v60 }
 0x63c   :  { %1780 = vmatpush3.msra.mxu1 %v2153_v61 }
 0x63d   :  { %1781 = vmatprep.subr.mxu1 %v2154_v6 }
 0x63e   :  { %1782 = vmatpush3.msra.mxu1 %v2155_v1 }
 0x63f   :  { %1783 = vmatprep.subr.mxu1 %v2156_v2 }
 0x640   :  { %1784 = vmatpush3.msra.mxu1 %v2157_v3 }
 0x641   :  { %1785 = vmatprep.subr.mxu1 %v2158_v4 }
 0x642   :  { %1786 = vmatpush3.msra.mxu1 %v2159_v5 }
 0x643   :  { %1787 = vmatprep.subr.mxu1 %v2160_v7 }
 0x644   :  { %1788 = vmatpush3.msra.mxu1 %v2161_v8 }
 0x6d8   :  { %v1257_v10 = vpop.f32.mrf.mxu0 }
 0x6d9   :  { %v1261_v11 = vadd.f32 %v1257_v10, %v1190_v9 }
 0x6da   :  { %v2071_v12 = vpop.f32.mrf.mxu0 }
 0x6db   :  { %v1262_v14 = vadd.f32 %v2162_v13, %v1261_v11 }
 0x6dd   :  { %2108 = vtanh.f32 %v1262_v14 }
 0x6e5   :  { %v1737_v15 = vpop.f32.mrf.mxu1 }
 0x6e7   :  { %v1738_v16 = vpop.f32.mrf.mxu1 }
 0x6e8   :  { %v1739_v17 = vadd.f32 %v1738_v16, %v1737_v15 }
 0x6ea   :  { %v2109_v18 = vpop.eup %2108  ;;  %v1183_v19 = vadd.f32 %v1739_v17, %v2641_v29 }
 0x6eb   :  { %1337 = vst [vmem:[#allocation11] sm:$0xff] %v2109_v18  ;;  %1328 = vmatprep.mubr.f32.mxu1 %v2109_v18 }
 0x6ec   :  { %2110 = vtanh.f32 %v1183_v19 }
 0x6f9   :  { %v2111_v20 = vpop.eup %2110 }
 0x6fa   :  { %1188 = vst [vmem:[#allocation10 + $0x30] sm:$0xff] %v2111_v20  ;;  %1329 = vmatmul.mubr.f32.vlgmr.msra.gmra.mxu1 %v2111_v20 }
 0x7ba   :  { %v1789_v21 = vpop.f32.mrf.mxu1 }
 0x7bc   :  { %v1790_v22 = vpop.f32.mrf.mxu1 }
 0x7bd   :  { %v1791_v23 = vadd.f32 %v1790_v22, %v1789_v21 }
 0x7bf   :  { %v1331_v24 = vadd.f32 %v1791_v23, %v2641_v29 }
 0x7c1   :  { %2112 = vtanh.f32 %v1331_v24 }
 0x7ce   :  { %v2113_v25 = vpop.eup %2112 }
 0x7cf   :  { %1336 = vst [vmem:[#allocation10 + $0x38] sm:$0xff] %v2113_v25  ;;  %1338 = vst [vmem:[#allocation11 + $0x8] sm:$0xff] %v2113_v25 }
 0x7d0   :  { %2254 = shalt.err (!%p2251_p10)
}
 0x7d1   :  { %1350 = dma.vmem_to_hbm [thread:$0]  %s1345_s24, 1024, %s3025_s6, [#allocation4], %s2295_s29, %s2295_s29, %s2296_s30  }
 0x7d2   :  { %s2263_s9 = scalar_lea.vmem %s1357_s26, 256  ;;  %p2268_p12 = scmp.lt.s32.totalorder %s1357_s26, %s1357_s26 }
 0x7d3   :  { %p2264_p11 = scmp.ne.s32.totalorder %s1357_s26, %s2263_s9  ;;  %p2269_p13 = scmp.lt.s32.totalorder %s2263_s9, %s2263_s9 }
 0x7d5   :  { %p2270_p0 = por %p2269_p13, %p2268_p12 }
 0x7d7   :  { %p2271_p1 = pnand %p2270_p0, %p2264_p11 }
 0x7d9   :  { %2274 = shalt.err (!%p2271_p1)
}
 0x7da   :  { %1362 = dma.vmem_to_hbm [thread:$0]  %s1357_s26, 256, %s3026_s7, [#allocation12], %s2295_s29, %s2295_s29, %s2296_s30  }
 0x7db   :  { %2289 = dma.done.wait [#allocation4], 1024  }
 0x7dc   :  { %2290 = vsyncadd [#allocation4], 4294966272 }
 0x7dd   :  { %2291 = dma.done.wait [#allocation12], 256  }
 0x7de   :  { %2292 = vsyncadd [#allocation12], 4294967040 }
 0x7df   :  { %1369 = vsyncpa [#allocation3], 1 }
 0x7e0   :  { %1370 = vsyncpa [#allocation6], 1 }
 0x7e1   :  { %1371 = vsyncpa [#allocation9], 1 }
 0x7e2   :  { %1372 = vsyncpa [#allocation4], 1 }
 0x7e3   :  { %1373 = vsyncpa [#allocation12], 1 }

</bundles_post_ra>
